<compile_context>
chip_gen: v6e
topology: v6e:2x2x1
jax: 0.10.0
libtpu: 0.0.40
codegen_flags: <defaults>
</compile_context>

<pallas_src>
import jax
import jax.numpy as jnp
from jax.experimental import pallas as pl
from jax.experimental.pallas import tpu as pltpu

IN_DIM = 5
HIDDEN = 200       # logical hidden width (matches the PyTorch module)
HID_PAD = 256      # padded hidden width (lane/MXU aligned)
OUT_DIM = 1
MAX_TILE_B = 1024  # batch rows per grid step (upper bound)


def _ceil_to(x, m):
    return ((x + m - 1) // m) * m


def putnet_kernel(xt_ref, w1_ref, b1_ref, w2_ref, b2_ref,
                  w3_ref, b3_ref, wo_ref, bo_ref, o_ref):
    """Fused MLP, transposed layout: activations are (features, batch_tile)."""
    xt = xt_ref[...]                                                    # (5, TB)
    h = jnp.dot(w1_ref[...], xt, preferred_element_type=jnp.float32)   # (256, TB)
    h = jnp.maximum(h + b1_ref[...], 0.0)
    h = jnp.dot(w2_ref[...], h, preferred_element_type=jnp.float32)    # (256, TB)
    h = jnp.maximum(h + b2_ref[...], 0.0)
    h = jnp.dot(w3_ref[...], h, preferred_element_type=jnp.float32)    # (256, TB)
    h = jnp.maximum(h + b3_ref[...], 0.0)
    out = jnp.dot(wo_ref[...], h, preferred_element_type=jnp.float32)  # (1, TB)
    o_ref[...] = (out + bo_ref[...]).astype(o_ref.dtype)               # lane-dense store


def init_params(key):
    """PyTorch-style nn.Linear init (uniform +-1/sqrt(fan_in)); weights (in, out)."""
    dims = [(IN_DIM, HIDDEN), (HIDDEN, HIDDEN), (HIDDEN, HIDDEN), (HIDDEN, OUT_DIM)]
    params = []
    for fan_in, fan_out in dims:
        key, kw, kb = jax.random.split(key, 3)
        bound = 1.0 / jnp.sqrt(fan_in)
        w = jax.random.uniform(kw, (fan_in, fan_out), jnp.float32, -bound, bound)
        b = jax.random.uniform(kb, (1, fan_out), jnp.float32, -bound, bound)
        params += [w, b]
    return tuple(params)


def prepare_params(params):
    """Convert (in, out)-layout params to kernel layout:
    transpose to (out, in), zero-pad the 200-wide hidden dim to 256,
    biases as (out, 1) columns (broadcast over the lane/batch axis)."""
    w1, b1, w2, b2, w3, b3, wo, bo = params

    def pad2d(a, shape):
        z = jnp.zeros(shape, a.dtype)
        return z.at[: a.shape[0], : a.shape[1]].set(a)

    w1t = pad2d(w1.T, (HID_PAD, IN_DIM))            # (256, 5)
    b1c = pad2d(b1.reshape(-1, 1), (HID_PAD, 1))    # (256, 1)
    w2t = pad2d(w2.T, (HID_PAD, HID_PAD))           # (256, 256)
    b2c = pad2d(b2.reshape(-1, 1), (HID_PAD, 1))
    w3t = pad2d(w3.T, (HID_PAD, HID_PAD))
    b3c = pad2d(b3.reshape(-1, 1), (HID_PAD, 1))
    wot = pad2d(wo.T, (OUT_DIM, HID_PAD))           # (1, 256)
    boc = bo.reshape(1, 1)                          # (1, 1)
    return (w1t, b1c, w2t, b2c, w3t, b3c, wot, boc)


def putnet_forward(x, kparams, *, max_tile_b=MAX_TILE_B):
    """x: (B, 5) float32; kparams from prepare_params(). Returns (B,) float32."""
    B = x.shape[0]

    # --- pick a batch tile: as large as allowed, lane-aligned (multiple of 128)
    B128 = _ceil_to(max(B, 1), 128)
    tile_b = min(_ceil_to(max_tile_b, 128), B128)
    # Prefer >= 2 grid steps so v7x's two TensorCores both get work.
    if pl.cdiv(B128, tile_b) < 2 and tile_b >= 256:
        tile_b = _ceil_to(tile_b // 2, 128)
    B_pad = _ceil_to(B128, tile_b)
    grid_b = B_pad // tile_b

    # Transpose batch onto the lane axis and zero-pad ragged batch sizes.
    xt = jnp.zeros((IN_DIM, B_pad), jnp.float32).at[:, :B].set(x.T)

    w1t, b1c, w2t, b2c, w3t, b3c, wot, boc = kparams

    # Full-extent blocks for weights/biases (constant index map -> resident,
    # not re-DMA'd per step).
    full = lambda a: pl.BlockSpec(a.shape, lambda i: (0,) * a.ndim)

    out = pl.pallas_call(
        putnet_kernel,
        out_shape=jax.ShapeDtypeStruct((1, B_pad), jnp.float32),
        grid_spec=pltpu.PrefetchScalarGridSpec(
            num_scalar_prefetch=0,
            grid=(grid_b,),
            in_specs=[
                pl.BlockSpec((IN_DIM, tile_b), lambda i: (0, i)),  # x^T batch tile
                full(w1t), full(b1c),
                full(w2t), full(b2c),
                full(w3t), full(b3c),
                full(wot), full(boc),
            ],
            out_specs=pl.BlockSpec((1, tile_b), lambda i: (0, i)),  # lane-dense out
        ),
        compiler_params=pltpu.CompilerParams(
            dimension_semantics=("parallel",)),
    )(xt, w1t, b1c, w2t, b2c, w3t, b3c, wot, boc)

    return out[0, :B]  # drop batch padding; equivalent to torch.squeeze(-1)


if __name__ == "__main__":
    key = jax.random.PRNGKey(0)
    kx, kp = jax.random.split(key)

    # Small, deliberately ragged batch (exercises padding to a 128 multiple
    # and a >= 2 step grid).
    B = 200
    x = jax.random.normal(kx, (B, IN_DIM), jnp.float32)

    params = init_params(kp)            # natural (in, out) layout, 200-wide
    kparams = prepare_params(params)    # transposed + padded kernel layout

    y = putnet_forward(x, kparams)
    jax.block_until_ready(y)

    # Pure-JAX reference of the original (unpadded) network.
    w1, b1, w2, b2, w3, b3, wo, bo = params
    h = jnp.maximum(x @ w1 + b1, 0.0)
    h = jnp.maximum(h @ w2 + b2, 0.0)
    h = jnp.maximum(h @ w3 + b3, 0.0)
    y_ref = (h @ wo + bo)[:, 0]

    assert y.shape == (B,)
    assert jnp.allclose(y, y_ref, atol=1e-4, rtol=1e-5), float(
        jnp.max(jnp.abs(y - y_ref)))

    print("KERNEL_OK")
</pallas_src>

<mosaic_0001>
module attributes {stable_mosaic.version = 11 : i64} {
  func.func @putnet_kernel(%arg0: i32, %arg1: memref<5x128xf32, #tpu.memory_space<vmem>>, %arg2: memref<256x5xf32, #tpu.memory_space<vmem>>, %arg3: memref<256x1xf32, #tpu.memory_space<vmem>>, %arg4: memref<256x256xf32, #tpu.memory_space<vmem>>, %arg5: memref<256x1xf32, #tpu.memory_space<vmem>>, %arg6: memref<256x256xf32, #tpu.memory_space<vmem>>, %arg7: memref<256x1xf32, #tpu.memory_space<vmem>>, %arg8: memref<1x256xf32, #tpu.memory_space<vmem>>, %arg9: memref<1x1xf32, #tpu.memory_space<vmem>>, %arg10: memref<1x128xf32, #tpu.memory_space<vmem>>) attributes {dimension_semantics = [#tpu.dimension_semantics<parallel>], iteration_bounds = array<i64: 2>, scalar_prefetch = 0 : i64, scratch_operands = 0 : i64, tpu.core_type = #tpu.core_type<tc>, window_params = [{transform_indices = @transform_0, window_bounds = array<i64: 5, 128>}, {pipeline_mode = #tpu.pipeline_mode<synchronous>, transform_indices = @transform_1, window_bounds = array<i64: 256, 5>}, {pipeline_mode = #tpu.pipeline_mode<synchronous>, transform_indices = @transform_2, window_bounds = array<i64: 256, 1>}, {pipeline_mode = #tpu.pipeline_mode<synchronous>, transform_indices = @transform_3, window_bounds = array<i64: 256, 256>}, {pipeline_mode = #tpu.pipeline_mode<synchronous>, transform_indices = @transform_4, window_bounds = array<i64: 256, 1>}, {pipeline_mode = #tpu.pipeline_mode<synchronous>, transform_indices = @transform_5, window_bounds = array<i64: 256, 256>}, {pipeline_mode = #tpu.pipeline_mode<synchronous>, transform_indices = @transform_6, window_bounds = array<i64: 256, 1>}, {pipeline_mode = #tpu.pipeline_mode<synchronous>, transform_indices = @transform_7, window_bounds = array<i64: 1, 256>}, {pipeline_mode = #tpu.pipeline_mode<synchronous>, transform_indices = @transform_8, window_bounds = array<i64: 1, 1>}, {transform_indices = @transform_9, window_bounds = array<i64: 1, 128>}]} {
    %c0 = arith.constant 0 : index
    %c0_0 = arith.constant 0 : index
    %0 = vector.load %arg1[%c0, %c0_0] : memref<5x128xf32, #tpu.memory_space<vmem>>, vector<5x128xf32>
    %c0_1 = arith.constant 0 : index
    %c0_2 = arith.constant 0 : index
    %1 = vector.load %arg2[%c0_1, %c0_2] : memref<256x5xf32, #tpu.memory_space<vmem>>, vector<256x5xf32>
    %cst = arith.constant dense<0.000000e+00> : vector<256x128xf32>
    %2 = tpu.matmul %1, %0, %cst {dimension_numbers = #tpu.dot_dimension_numbers<[1], [0], [0], [1], [0, 0, 1, 1], [], []>} : vector<256x5xf32>, vector<5x128xf32>, vector<256x128xf32> -> vector<256x128xf32>
    %c0_3 = arith.constant 0 : index
    %c0_4 = arith.constant 0 : index
    %3 = vector.load %arg3[%c0_3, %c0_4] : memref<256x1xf32, #tpu.memory_space<vmem>>, vector<256x1xf32>
    %4 = vector.broadcast %3 : vector<256x1xf32> to vector<256x128xf32>
    %5 = arith.addf %2, %4 : vector<256x128xf32>
    %cst_5 = arith.constant 0.000000e+00 : f32
    %6 = vector.broadcast %cst_5 : f32 to vector<256x128xf32>
    %7 = arith.maximumf %5, %6 : vector<256x128xf32>
    %c0_6 = arith.constant 0 : index
    %c0_7 = arith.constant 0 : index
    %8 = vector.load %arg4[%c0_6, %c0_7] : memref<256x256xf32, #tpu.memory_space<vmem>>, vector<256x256xf32>
    %cst_8 = arith.constant dense<0.000000e+00> : vector<256x128xf32>
    %9 = tpu.matmul %8, %7, %cst_8 {dimension_numbers = #tpu.dot_dimension_numbers<[1], [0], [0], [1], [0, 0, 1, 1], [], []>} : vector<256x256xf32>, vector<256x128xf32>, vector<256x128xf32> -> vector<256x128xf32>
    %c0_9 = arith.constant 0 : index
    %c0_10 = arith.constant 0 : index
    %10 = vector.load %arg5[%c0_9, %c0_10] : memref<256x1xf32, #tpu.memory_space<vmem>>, vector<256x1xf32>
    %11 = vector.broadcast %10 : vector<256x1xf32> to vector<256x128xf32>
    %12 = arith.addf %9, %11 : vector<256x128xf32>
    %cst_11 = arith.constant 0.000000e+00 : f32
    %13 = vector.broadcast %cst_11 : f32 to vector<256x128xf32>
    %14 = arith.maximumf %12, %13 : vector<256x128xf32>
    %c0_12 = arith.constant 0 : index
    %c0_13 = arith.constant 0 : index
    %15 = vector.load %arg6[%c0_12, %c0_13] : memref<256x256xf32, #tpu.memory_space<vmem>>, vector<256x256xf32>
    %cst_14 = arith.constant dense<0.000000e+00> : vector<256x128xf32>
    %16 = tpu.matmul %15, %14, %cst_14 {dimension_numbers = #tpu.dot_dimension_numbers<[1], [0], [0], [1], [0, 0, 1, 1], [], []>} : vector<256x256xf32>, vector<256x128xf32>, vector<256x128xf32> -> vector<256x128xf32>
    %c0_15 = arith.constant 0 : index
    %c0_16 = arith.constant 0 : index
    %17 = vector.load %arg7[%c0_15, %c0_16] : memref<256x1xf32, #tpu.memory_space<vmem>>, vector<256x1xf32>
    %18 = vector.broadcast %17 : vector<256x1xf32> to vector<256x128xf32>
    %19 = arith.addf %16, %18 : vector<256x128xf32>
    %cst_17 = arith.constant 0.000000e+00 : f32
    %20 = vector.broadcast %cst_17 : f32 to vector<256x128xf32>
    %21 = arith.maximumf %19, %20 : vector<256x128xf32>
    %c0_18 = arith.constant 0 : index
    %c0_19 = arith.constant 0 : index
    %22 = vector.load %arg8[%c0_18, %c0_19] : memref<1x256xf32, #tpu.memory_space<vmem>>, vector<1x256xf32>
    %cst_20 = arith.constant dense<0.000000e+00> : vector<1x128xf32>
    %23 = tpu.matmul %22, %21, %cst_20 {dimension_numbers = #tpu.dot_dimension_numbers<[1], [0], [0], [1], [0, 0, 1, 1], [], []>} : vector<1x256xf32>, vector<256x128xf32>, vector<1x128xf32> -> vector<1x128xf32>
    %c0_21 = arith.constant 0 : index
    %c0_22 = arith.constant 0 : index
    %24 = vector.load %arg9[%c0_21, %c0_22] : memref<1x1xf32, #tpu.memory_space<vmem>>, vector<1x1xf32>
    %25 = vector.broadcast %24 : vector<1x1xf32> to vector<1x128xf32>
    %26 = arith.addf %23, %25 : vector<1x128xf32>
    %c0_23 = arith.constant 0 : index
    %c0_24 = arith.constant 0 : index
    %27 = vector.load %arg10[%c0_23, %c0_24] : memref<1x128xf32, #tpu.memory_space<vmem>>, vector<1x128xf32>
    tpu.vector_store %arg10[%c0_23, %c0_24], %26 {strides = array<i32>} : memref<1x128xf32, #tpu.memory_space<vmem>>, vector<1x128xf32>,
    return
  }
  func.func @transform_0(%arg0: i32) -> (i32, i32) {
    %c0_i32 = arith.constant 0 : i32
    %c0_i32_0 = arith.constant 0 : i32
    return %c0_i32, %arg0 : i32, i32
  }
  func.func @transform_1(%arg0: i32) -> (i32, i32) {
    %c0_i32 = arith.constant 0 : i32
    %c0_i32_0 = arith.constant 0 : i32
    %c0_i32_1 = arith.constant 0 : i32
    return %c0_i32, %c0_i32_0 : i32, i32
  }
  func.func @transform_2(%arg0: i32) -> (i32, i32) {
    %c0_i32 = arith.constant 0 : i32
    %c0_i32_0 = arith.constant 0 : i32
    %c0_i32_1 = arith.constant 0 : i32
    return %c0_i32, %c0_i32_0 : i32, i32
  }
  func.func @transform_3(%arg0: i32) -> (i32, i32) {
    %c0_i32 = arith.constant 0 : i32
    %c0_i32_0 = arith.constant 0 : i32
    %c0_i32_1 = arith.constant 0 : i32
    return %c0_i32, %c0_i32_0 : i32, i32
  }
  func.func @transform_4(%arg0: i32) -> (i32, i32) {
    %c0_i32 = arith.constant 0 : i32
    %c0_i32_0 = arith.constant 0 : i32
    %c0_i32_1 = arith.constant 0 : i32
    return %c0_i32, %c0_i32_0 : i32, i32
  }
  func.func @transform_5(%arg0: i32) -> (i32, i32) {
    %c0_i32 = arith.constant 0 : i32
    %c0_i32_0 = arith.constant 0 : i32
    %c0_i32_1 = arith.constant 0 : i32
    return %c0_i32, %c0_i32_0 : i32, i32
  }
  func.func @transform_6(%arg0: i32) -> (i32, i32) {
    %c0_i32 = arith.constant 0 : i32
    %c0_i32_0 = arith.constant 0 : i32
    %c0_i32_1 = arith.constant 0 : i32
    return %c0_i32, %c0_i32_0 : i32, i32
  }
  func.func @transform_7(%arg0: i32) -> (i32, i32) {
    %c0_i32 = arith.constant 0 : i32
    %c0_i32_0 = arith.constant 0 : i32
    %c0_i32_1 = arith.constant 0 : i32
    return %c0_i32, %c0_i32_0 : i32, i32
  }
  func.func @transform_8(%arg0: i32) -> (i32, i32) {
    %c0_i32 = arith.constant 0 : i32
    %c0_i32_0 = arith.constant 0 : i32
    %c0_i32_1 = arith.constant 0 : i32
    return %c0_i32, %c0_i32_0 : i32, i32
  }
  func.func @transform_9(%arg0: i32) -> (i32, i32) {
    %c0_i32 = arith.constant 0 : i32
    %c0_i32_0 = arith.constant 0 : i32
    return %c0_i32, %arg0 : i32, i32
  }
}

</mosaic_0001>

<bundles_post_ra>
// kernel: tpu_custom_call.1
= control target key start
LH: loop header
LB: loop body
LE: loop exit
PB: predicated region body
PF: predicated region fallthrough
CT: control target
= control target key end

     0   :  { %s3531_s0 = inlined_call_operand.vmem [shape: f32[5,256], index: 0, kind: input, shape index: {}]   ;;  %s3532_s1 = inlined_call_operand.vmem [shape: f32[256,5], index: 1, kind: input, shape index: {}]   ;;  %s3533_s2 = inlined_call_operand.vmem [shape: f32[256,1], index: 2, kind: input, shape index: {}]   ;;  %s3534_s3 = inlined_call_operand.vmem [shape: f32[256,256], index: 3, kind: input, shape index: {}]   ;;  %s3535_s4 = inlined_call_operand.vmem [shape: f32[256,1], index: 4, kind: input, shape index: {}]   ;;  %s3536_s5 = inlined_call_operand.vmem [shape: f32[256,256], index: 5, kind: input, shape index: {}]   ;;  %s3537_s6 = inlined_call_operand.vmem [shape: f32[256,1], index: 6, kind: input, shape index: {}]   ;;  %s3538_s7 = inlined_call_operand.vmem [shape: f32[1,256], index: 7, kind: input, shape index: {}]   ;;  %s3539_s8 = inlined_call_operand.<no memory space> [shape: f32[1,1], index: 8, kind: input, shape index: {}]   ;;  %s3540_s9 = inlined_call_operand.hbm [shape: f32[1,256], index: 9, kind: output, shape index: {}]  }
   0x1   :  { %v14_v0 = vstv %s3539_s8 }
   0x2   :  { %15 = vst [vmem:[#allocation2] sm:$0x1] %v14_v0 }
   0x3   :  { %16 = vsyncpa [#allocation4], 0 }
   0x4   :  { %18 = vsyncpa [#allocation4 + $0x1], 0  ;;  %s2419_s11 = smov 0   ;;  %s2421_s12 = smov 0  }
   0x5   :  { %s2423_s13 = smov 0   ;;  %s2425_s14 = smov 0  }
   0x6 LB: > { %s2440_s8 = sadd.s32 4294967295, %s2361_s14   ;;  %s2099_s15 = sadd.s32 4294967294, %s2361_s14   ;;  %s2361_s14 = sphi %s2425_s14, %s3562_s14   ;;  %s2357_s13 = sphi %s2423_s13, %s3561_s13   ;;  %s2353_s12 = sphi %s2421_s12, %s3560_s12   ;;  %s2349_s11 = sphi %s2419_s11, %s3559_s11  }
   0x7   : > { %s2444_s16 = sadd.s32 1, %s2361_s14   ;;  %s225_s17 = sadd.s32 1, %s2357_s13 }
   0x8   : > { %s222_s18 = ssub.s32 %s2361_s14, %s2444_s16  ;;  %p235_p0 = scmp.ne.s32.totalorder %s2357_s13, %s2353_s12 }
   0x9   : > { %p223_p1 = scmp.eq.s32.totalorder %s222_s18, 0  ;;  %p236_p2 = scmp.eq.s32.totalorder %s2440_s8, 1 }
   0xa   : > { %p241_p3 = scmp.ne.s32.totalorder %s2353_s12, %s2349_s11  ;;  %p242_p4 = scmp.eq.s32.totalorder %s2099_s15, 1 }
   0xb   : > { %s2455_s19 = scalar_select %p223_p1, %s2357_s13, %s225_s17  }
   0xc   : > { %p2457_p5 = por %p236_p2, %p235_p0  ;;  %p2461_p6 = por %p242_p4, %p241_p3 }
   0xd   : > { %p2102_p7 = scmp.ge.s32.totalorder %s2361_s14, 1  ;;  %p291_p8 = scmp.lt.s32.totalorder %s2361_s14, 3 }
   0xf   : > { %p292_p9 = pnand %p2102_p7, %p291_p8 }
  0x11   : > { %295 = sbr.rel (%p292_p9) target bundleno = 1236 (0x4d4), region = 56 }
  0x16   : > { %v377_v1 = vld [vmem:[%s3533_s2 + $0x78] sm:$0xff]  ;;  %v375_v2 = vld [vmem:[%s3533_s2 + $0x68] sm:$0xff]  ;;  %p325_p10 = scmp.lt.s32.totalorder %s2440_s8, 1  ;;  %v2363_v3 = vmov 0   ;;  %v330_v4 = vld [vmem:[%s3532_s1] sm:$0xff]  ;;  %vm554_vm0 = vcmask 39936  }
  0x17   : > { %2300 = vset.pattern.permute.xlu1 %v2363_v3  ;;  %2299 = vset.pattern.permute.xlu0 %v2363_v3  ;;  %v376_v5 = vld [vmem:[%s3533_s2 + $0x70] sm:$0xff]  ;;  %v374_v6 = vld [vmem:[%s3533_s2 + $0x60] sm:$0xff]  ;;  %vm651_vm1 = vcmask 1044480   ;;  %v331_v8 = vld [vmem:[%s3532_s1 + $0x8] sm:$0xff]  ;;  %s323_s18 = sand.u32 1, %s2353_s12   ;;  %s2137_s22 = sshll.u32 %s2440_s8, 4 }
  0x18   : > { %471 = vperm.xlu0 %2299, %v377_v1   ;;  %461 = vperm.xlu1 %2300, %v375_v2   ;;  %s326_s28 = scalar_select %p325_p10, %s2440_s8, 1  ;;  %v373_v9 = vld [vmem:[%s3533_s2 + $0x58] sm:$0xff]  ;;  %v372_v10 = vld [vmem:[%s3533_s2 + $0x50] sm:$0xff]  ;;  %v371_v13 = vld [vmem:[%s3533_s2 + $0x48] sm:$0xff] }
  0x19   : > { %2210 = vmatprep.mubr.msk.f32.mxu0 %vm554_vm0, %v330_v4  ;;  %v332_v11 = vld [vmem:[%s3532_s1 + $0x10] sm:$0xff]  ;;  %v333_v12 = vld [vmem:[%s3532_s1 + $0x18] sm:$0xff]  ;;  %v370_v14 = vld [vmem:[%s3533_s2 + $0x40] sm:$0xff]  ;;  %s2042_s27 = scalar_lea.hbm %s3540_s9, %s2137_s22  ;;  %s2032_s29 = scalar_lea.sflag [#allocation4], %s323_s18 }
  0x1a   : > { %s2103_s17 = sshll.u32 %s326_s28, 3  ;;  %v334_v15 = vld [vmem:[%s3532_s1 + $0x20] sm:$0xff]  ;;  %v335_v16 = vld [vmem:[%s3532_s1 + $0x28] sm:$0xff]  ;;  %v369_v17 = vld [vmem:[%s3533_s2 + $0x38] sm:$0xff]  ;;  %s2365_s28 = smov [#allocation3]  }
  0x1b   : > { %s328_s23 = scalar_lea.vmem %s3531_s0, %s2103_s17  ;;  %v368_v18 = vld [vmem:[%s3533_s2 + $0x30] sm:$0xff]  ;;  %v337_v20 = vld [vmem:[%s3532_s1 + $0x38] sm:$0xff]  ;;  %v367_v21 = vld [vmem:[%s3533_s2 + $0x28] sm:$0xff]  ;;  %s2305_s10 = sshll.u32 %s2365_s28, 4  ;;  %s2306_s10 = int_to_ptr.vmem [resolvable:$false] %s2305_s10 }
  0x1c   : > { %466 = vperm.xlu0 %2299, %v376_v5   ;;  %456 = vperm.xlu1 %2300, %v374_v6   ;;  %v329_v7 = vld [vmem:[%s328_s23] sm:$0x1f]  ;;  %v336_v19 = vld [vmem:[%s3532_s1 + $0x30] sm:$0xff]  ;;  %v339_v24 = vld [vmem:[%s3532_s1 + $0x48] sm:$0xff]  ;;  %s324_s23 = scalar_lea.vmem [#allocation3], %s323_s18  ;;  %s2307_s8 = scalar_lea.vmem %s2306_s10, 32 }
  0x1d   : > { %2208 = vmatprep.subr.msk.mxu0 %vm651_vm1, %v329_v7  ;;  %v366_v22 = vld [vmem:[%s3533_s2 + $0x20] sm:$0xff]  ;;  %v365_v25 = vld [vmem:[%s3533_s2 + $0x18] sm:$0xff]  ;;  %v364_v26 = vld [vmem:[%s3533_s2 + $0x10] sm:$0xff]  ;;  %s2044_s24 = sshll.u32 %s324_s23, 4  ;;  %s2045_s24 = int_to_ptr.vmem [resolvable:$true] %s2044_s24 }
  0x1e   : > { %2209 = vmatpush3.msk.msra.mxu0 %vm651_vm1, %v329_v7  ;;  %v338_v23 = vld [vmem:[%s3532_s1 + $0x40] sm:$0xff]  ;;  %v340_v27 = vld [vmem:[%s3532_s1 + $0x50] sm:$0xff]  ;;  %v341_v28 = vld [vmem:[%s3532_s1 + $0x58] sm:$0xff]  ;;  %s2301_s30 = scalar_lea.vmem %s2045_s24, 16  ;;  %p2308_p0 = scmp.lt.s32.totalorder %s2045_s24, %s2306_s10 }
  0x1f   : > { %2211 = vmatmul.mubr.msk.f32.vlgmr.msra.gmra.mxu0 %vm554_vm0, %v331_v8  ;;  %v363_v29 = vld [vmem:[%s3533_s2 + $0x8] sm:$0xff]  ;;  %v362_v30 = vld [vmem:[%s3533_s2] sm:$0xff]  ;;  %v393_v33 = vld [vmem:[%s3533_s2 + $0xf8] sm:$0xff]  ;;  %p2302_p11 = scmp.ne.s32.totalorder %s2045_s24, %s2301_s30  ;;  %p2309_p1 = scmp.lt.s32.totalorder %s2307_s8, %s2301_s30 }
  0x20   : > { %451 = vperm.xlu0 %2299, %v373_v9   ;;  %446 = vperm.xlu1 %2300, %v372_v10   ;;  %v342_v31 = vld [vmem:[%s3532_s1 + $0x60] sm:$0xff]  ;;  %v343_v32 = vld [vmem:[%s3532_s1 + $0x68] sm:$0xff]  ;;  %v392_v34 = vld [vmem:[%s3533_s2 + $0xf0] sm:$0xff] }
  0x21   : > { %2213 = vmatprep.mubr.msk.f32.mxu0 %vm554_vm0, %v332_v11  ;;  %v344_v35 = vld [vmem:[%s3532_s1 + $0x70] sm:$0xff]  ;;  %v345_v36 = vld [vmem:[%s3532_s1 + $0x78] sm:$0xff]  ;;  %v391_v37 = vld [vmem:[%s3533_s2 + $0xe8] sm:$0xff]  ;;  %p2303_p12 = pnand %p2302_p11, %p2457_p5  ;;  %p2310_p2 = por %p2309_p1, %p2308_p0 }
  0x22   : > { %v390_v38 = vld [vmem:[%s3533_s2 + $0xe0] sm:$0xff]  ;;  %v347_v40 = vld [vmem:[%s3532_s1 + $0x88] sm:$0xff]  ;;  %v389_v41 = vld [vmem:[%s3533_s2 + $0xd8] sm:$0xff] }
  0x23   : > { %2214 = vmatmul.mubr.msk.f32.gmra.mxu0 %vm554_vm0, %v333_v12  ;;  %v346_v39 = vld [vmem:[%s3532_s1 + $0x80] sm:$0xff]  ;;  %v388_v42 = vld [vmem:[%s3533_s2 + $0xd0] sm:$0xff]  ;;  %v349_v44 = vld [vmem:[%s3532_s1 + $0x98] sm:$0xff]  ;;  %p2304_p13 = pneg %p2303_p12 }
  0x24   : > { %441 = vperm.xlu0 %2299, %v371_v13   ;;  %436 = vperm.xlu1 %2300, %v370_v14   ;;  %v348_v43 = vld [vmem:[%s3532_s1 + $0x90] sm:$0xff]  ;;  %v387_v45 = vld [vmem:[%s3533_s2 + $0xc8] sm:$0xff]  ;;  %v386_v46 = vld [vmem:[%s3533_s2 + $0xc0] sm:$0xff] }
  0x25   : > { %2216 = vmatprep.mubr.msk.f32.mxu0 %vm554_vm0, %v334_v15  ;;  %v350_v47 = vld [vmem:[%s3532_s1 + $0xa0] sm:$0xff]  ;;  %v351_v48 = vld [vmem:[%s3532_s1 + $0xa8] sm:$0xff]  ;;  %v385_v49 = vld [vmem:[%s3533_s2 + $0xb8] sm:$0xff]  ;;  %p2311_p3 = pnand %p2310_p2, %p2304_p13 }
  0x26   : > { %v384_v50 = vld [vmem:[%s3533_s2 + $0xb0] sm:$0xff]  ;;  %v353_v52 = vld [vmem:[%s3532_s1 + $0xb8] sm:$0xff]  ;;  %v383_v53 = vld [vmem:[%s3533_s2 + $0xa8] sm:$0xff] }
  0x27   : > { %2217 = vmatmul.mubr.msk.f32.gmra.mxu0 %vm554_vm0, %v335_v16  ;;  %v352_v51 = vld [vmem:[%s3532_s1 + $0xb0] sm:$0xff]  ;;  %v382_v54 = vld [vmem:[%s3533_s2 + $0xa0] sm:$0xff]  ;;  %v355_v56 = vld [vmem:[%s3532_s1 + $0xc8] sm:$0xff] }
  0x28   : > { %431 = vperm.xlu0 %2299, %v369_v17   ;;  %426 = vperm.xlu1 %2300, %v368_v18   ;;  %v354_v55 = vld [vmem:[%s3532_s1 + $0xc0] sm:$0xff]  ;;  %v381_v57 = vld [vmem:[%s3533_s2 + $0x98] sm:$0xff]  ;;  %v380_v58 = vld [vmem:[%s3533_s2 + $0x90] sm:$0xff] }
  0x29   : > { %2219 = vmatprep.mubr.msk.f32.mxu0 %vm554_vm0, %v336_v19  ;;  %v356_v59 = vld [vmem:[%s3532_s1 + $0xd0] sm:$0xff]  ;;  %v357_v60 = vld [vmem:[%s3532_s1 + $0xd8] sm:$0xff]  ;;  %v379_v61 = vld [vmem:[%s3533_s2 + $0x88] sm:$0xff] }
  0x2a   : > { %v378_v62 = vld [vmem:[%s3533_s2 + $0x80] sm:$0xff]  ;;  %v359_v0 = vld [vmem:[%s3532_s1 + $0xe8] sm:$0xff]  ;;  %v991_v1 = vld [vmem:[%s3535_s4 + $0x78] sm:$0xff] }
  0x2b   : > { %2220 = vmatmul.mubr.msk.f32.gmra.mxu0 %vm554_vm0, %v337_v20  ;;  %v358_v63 = vld [vmem:[%s3532_s1 + $0xe0] sm:$0xff]  ;;  %v990_v2 = vld [vmem:[%s3535_s4 + $0x70] sm:$0xff]  ;;  %v361_v4 = vld [vmem:[%s3532_s1 + $0xf8] sm:$0xff] }
  0x2c   : > { %421 = vperm.xlu0 %2299, %v367_v21   ;;  %416 = vperm.xlu1 %2300, %v366_v22   ;;  %v360_v3 = vld [vmem:[%s3532_s1 + $0xf0] sm:$0xff]  ;;  %v989_v5 = vld [vmem:[%s3535_s4 + $0x68] sm:$0xff]  ;;  %v988_v6 = vld [vmem:[%s3535_s4 + $0x60] sm:$0xff] }
  0x2d   : > { %2222 = vmatprep.mubr.msk.f32.mxu0 %vm554_vm0, %v338_v23  ;;  %v987_v7 = vld [vmem:[%s3535_s4 + $0x58] sm:$0xff]  ;;  %v986_v8 = vld [vmem:[%s3535_s4 + $0x50] sm:$0xff]  ;;  %v985_v9 = vld [vmem:[%s3535_s4 + $0x48] sm:$0xff] }
  0x2e   : > { %v984_v10 = vld [vmem:[%s3535_s4 + $0x40] sm:$0xff]  ;;  %v983_v11 = vld [vmem:[%s3535_s4 + $0x38] sm:$0xff]  ;;  %v982_v12 = vld [vmem:[%s3535_s4 + $0x30] sm:$0xff] }
  0x2f   : > { %2223 = vmatmul.mubr.msk.f32.gmra.mxu0 %vm554_vm0, %v339_v24  ;;  %v981_v13 = vld [vmem:[%s3535_s4 + $0x28] sm:$0xff]  ;;  %v980_v14 = vld [vmem:[%s3535_s4 + $0x20] sm:$0xff]  ;;  %v979_v15 = vld [vmem:[%s3535_s4 + $0x18] sm:$0xff] }
  0x30   : > { %411 = vperm.xlu0 %2299, %v365_v25   ;;  %406 = vperm.xlu1 %2300, %v364_v26   ;;  %v978_v16 = vld [vmem:[%s3535_s4 + $0x10] sm:$0xff]  ;;  %v977_v17 = vld [vmem:[%s3535_s4 + $0x8] sm:$0xff]  ;;  %v976_v18 = vld [vmem:[%s3535_s4] sm:$0xff] }
  0x31   : > { %2225 = vmatprep.mubr.msk.f32.mxu0 %vm554_vm0, %v340_v27  ;;  %v1007_v19 = vld [vmem:[%s3535_s4 + $0xf8] sm:$0xff]  ;;  %v1006_v20 = vld [vmem:[%s3535_s4 + $0xf0] sm:$0xff]  ;;  %v1005_v21 = vld [vmem:[%s3535_s4 + $0xe8] sm:$0xff]  ;;  %v2364_v27 = vmov 0.0  }
  0x32   : > { %v1004_v22 = vld [vmem:[%s3535_s4 + $0xe0] sm:$0xff]  ;;  %v1003_v23 = vld [vmem:[%s3535_s4 + $0xd8] sm:$0xff]  ;;  %v1002_v24 = vld [vmem:[%s3535_s4 + $0xd0] sm:$0xff]  ;;  %1168 = vmatprep.subr.mxu1 %v2364_v27  ;;  %1681 = vmatprep.subr.mxu0 %v2364_v27 }
  0x33   : > { %2226 = vmatmul.mubr.msk.f32.gmra.mxu0 %vm554_vm0, %v341_v28  ;;  %v1001_v25 = vld [vmem:[%s3535_s4 + $0xc8] sm:$0xff]  ;;  %v1000_v26 = vld [vmem:[%s3535_s4 + $0xc0] sm:$0xff]  ;;  %v999_v28 = vld [vmem:[%s3535_s4 + $0xb8] sm:$0xff] }
  0x34   : > { %401 = vperm.xlu0 %2299, %v363_v29   ;;  %396 = vperm.xlu1 %2300, %v362_v30   ;;  %v998_v29 = vld [vmem:[%s3535_s4 + $0xb0] sm:$0xff]  ;;  %v997_v30 = vld [vmem:[%s3535_s4 + $0xa8] sm:$0xff] }
  0x35   : > { %2228 = vmatprep.mubr.msk.f32.mxu0 %vm554_vm0, %v342_v31  ;;  %v996_v31 = vld [vmem:[%s3535_s4 + $0xa0] sm:$0xff] }
  0x37   : > { %2229 = vmatmul.mubr.msk.f32.gmra.mxu0 %vm554_vm0, %v343_v32  ;;  %v995_v32 = vld [vmem:[%s3535_s4 + $0x98] sm:$0xff] }
  0x38   : > { %551 = vperm.xlu0 %2299, %v393_v33   ;;  %546 = vperm.xlu1 %2300, %v392_v34   ;;  %v994_v33 = vld [vmem:[%s3535_s4 + $0x90] sm:$0xff]  ;;  %v993_v34 = vld [vmem:[%s3535_s4 + $0x88] sm:$0xff] }
  0x39   : > { %2231 = vmatprep.mubr.msk.f32.mxu0 %vm554_vm0, %v344_v35  ;;  %v992_v35 = vld [vmem:[%s3535_s4 + $0x80] sm:$0xff] }
  0x3b   : > { %2232 = vmatmul.mubr.msk.f32.gmra.mxu0 %vm554_vm0, %v345_v36  ;;  %v1520_v36 = vld [vmem:[%s3537_s6 + $0xf8] sm:$0xff] }
  0x3c   : > { %541 = vperm.xlu0 %2299, %v391_v37   ;;  %536 = vperm.xlu1 %2300, %v390_v38   ;;  %v1504_v37 = vld [vmem:[%s3537_s6 + $0x78] sm:$0xff]  ;;  %v1519_v38 = vld [vmem:[%s3537_s6 + $0xf0] sm:$0xff] }
  0x3d   : > { %2234 = vmatprep.mubr.msk.f32.mxu0 %vm554_vm0, %v346_v39  ;;  %v1503_v39 = vld [vmem:[%s3537_s6 + $0x70] sm:$0xff] }
  0x3f   : > { %2235 = vmatmul.mubr.msk.f32.gmra.mxu0 %vm554_vm0, %v347_v40  ;;  %v1518_v40 = vld [vmem:[%s3537_s6 + $0xe8] sm:$0xff] }
  0x40   : > { %531 = vperm.xlu0 %2299, %v389_v41   ;;  %526 = vperm.xlu1 %2300, %v388_v42   ;;  %v1502_v41 = vld [vmem:[%s3537_s6 + $0x68] sm:$0xff]  ;;  %v1517_v42 = vld [vmem:[%s3537_s6 + $0xe0] sm:$0xff] }
  0x41   : > { %2237 = vmatprep.mubr.msk.f32.mxu0 %vm554_vm0, %v348_v43  ;;  %v1501_v43 = vld [vmem:[%s3537_s6 + $0x60] sm:$0xff] }
  0x43   : > { %2238 = vmatmul.mubr.msk.f32.gmra.mxu0 %vm554_vm0, %v349_v44  ;;  %v1516_v44 = vld [vmem:[%s3537_s6 + $0xd8] sm:$0xff] }
  0x44   : > { %521 = vperm.xlu0 %2299, %v387_v45   ;;  %516 = vperm.xlu1 %2300, %v386_v46   ;;  %v1500_v45 = vld [vmem:[%s3537_s6 + $0x58] sm:$0xff]  ;;  %v1515_v46 = vld [vmem:[%s3537_s6 + $0xd0] sm:$0xff] }
  0x45   : > { %2240 = vmatprep.mubr.msk.f32.mxu0 %vm554_vm0, %v350_v47  ;;  %v1499_v47 = vld [vmem:[%s3537_s6 + $0x50] sm:$0xff] }
  0x47   : > { %2241 = vmatmul.mubr.msk.f32.gmra.mxu0 %vm554_vm0, %v351_v48  ;;  %v1514_v48 = vld [vmem:[%s3537_s6 + $0xc8] sm:$0xff] }
  0x48   : > { %511 = vperm.xlu0 %2299, %v385_v49   ;;  %506 = vperm.xlu1 %2300, %v384_v50   ;;  %v1498_v49 = vld [vmem:[%s3537_s6 + $0x48] sm:$0xff]  ;;  %v1513_v50 = vld [vmem:[%s3537_s6 + $0xc0] sm:$0xff] }
  0x49   : > { %2243 = vmatprep.mubr.msk.f32.mxu0 %vm554_vm0, %v352_v51  ;;  %v1497_v51 = vld [vmem:[%s3537_s6 + $0x40] sm:$0xff] }
  0x4b   : > { %2244 = vmatmul.mubr.msk.f32.gmra.mxu0 %vm554_vm0, %v353_v52  ;;  %v1512_v52 = vld [vmem:[%s3537_s6 + $0xb8] sm:$0xff] }
  0x4c   : > { %501 = vperm.xlu0 %2299, %v383_v53   ;;  %496 = vperm.xlu1 %2300, %v382_v54   ;;  %v1496_v53 = vld [vmem:[%s3537_s6 + $0x38] sm:$0xff]  ;;  %v1511_v54 = vld [vmem:[%s3537_s6 + $0xb0] sm:$0xff] }
  0x4d   : > { %2246 = vmatprep.mubr.msk.f32.mxu0 %vm554_vm0, %v354_v55  ;;  %v1495_v55 = vld [vmem:[%s3537_s6 + $0x30] sm:$0xff] }
  0x4f   : > { %2247 = vmatmul.mubr.msk.f32.gmra.mxu0 %vm554_vm0, %v355_v56  ;;  %v1510_v56 = vld [vmem:[%s3537_s6 + $0xa8] sm:$0xff] }
  0x50   : > { %491 = vperm.xlu0 %2299, %v381_v57   ;;  %486 = vperm.xlu1 %2300, %v380_v58   ;;  %v1494_v57 = vld [vmem:[%s3537_s6 + $0x28] sm:$0xff] }
  0x51   : > { %2249 = vmatprep.mubr.msk.f32.mxu0 %vm554_vm0, %v356_v59  ;;  %v913_v58 = vld [vmem:[%s3534_s3 + $0x8] sm:$0xff]  ;;  %v1509_v59 = vld [vmem:[%s3537_s6 + $0xa0] sm:$0xff] }
  0x52   : > { %1232 = vmatprep.mubr.f32.mxu1 %v913_v58 }
  0x53   : > { %2250 = vmatmul.mubr.msk.f32.gmra.mxu0 %vm554_vm0, %v357_v60  ;;  %v1493_v60 = vld [vmem:[%s3537_s6 + $0x20] sm:$0xff] }
  0x54   : > { %481 = vperm.xlu0 %2299, %v379_v61   ;;  %476 = vperm.xlu1 %2300, %v378_v62   ;;  %v1508_v61 = vld [vmem:[%s3537_s6 + $0x98] sm:$0xff] }
  0x55   : > { %2252 = vmatprep.mubr.msk.f32.mxu0 %vm554_vm0, %v358_v63  ;;  %v1492_v62 = vld [vmem:[%s3537_s6 + $0x18] sm:$0xff]  ;;  %v1507_v63 = vld [vmem:[%s3537_s6 + $0x90] sm:$0xff] }
  0x57   : > { %2253 = vmatmul.mubr.msk.f32.gmra.mxu0 %vm554_vm0, %v359_v0  ;;  %v1491_v0 = vld [vmem:[%s3537_s6 + $0x10] sm:$0xff] }
  0x58   : > { %1085 = vperm.xlu0 %2299, %v991_v1   ;;  %1080 = vperm.xlu1 %2300, %v990_v2   ;;  %v1506_v1 = vld [vmem:[%s3537_s6 + $0x88] sm:$0xff] }
  0x59   : > { %2255 = vmatprep.mubr.msk.f32.mxu0 %vm554_vm0, %v360_v3  ;;  %v1490_v2 = vld [vmem:[%s3537_s6 + $0x8] sm:$0xff]  ;;  %v1505_v3 = vld [vmem:[%s3537_s6 + $0x80] sm:$0xff] }
  0x5b   : > { %2256 = vmatmul.mubr.msk.f32.gmra.mxu0 %vm554_vm0, %v361_v4  ;;  %v1489_v4 = vld [vmem:[%s3537_s6] sm:$0xff] }
  0x5c   : > { %1075 = vperm.xlu0 %2299, %v989_v5   ;;  %1070 = vperm.xlu1 %2300, %v988_v6   ;;  %v1939_v5 = vld [vmem:[#allocation2] sm:$0x1] }
  0x60   : > { %1065 = vperm.xlu0 %2299, %v987_v7   ;;  %1060 = vperm.xlu1 %2300, %v986_v8  }
  0x64   : > { %1055 = vperm.xlu0 %2299, %v985_v9   ;;  %1050 = vperm.xlu1 %2300, %v984_v10  }
  0x68   : > { %1045 = vperm.xlu0 %2299, %v983_v11   ;;  %1040 = vperm.xlu1 %2300, %v982_v12  }
  0x6c   : > { %1035 = vperm.xlu0 %2299, %v981_v13   ;;  %1030 = vperm.xlu1 %2300, %v980_v14  }
  0x70   : > { %1025 = vperm.xlu0 %2299, %v979_v15   ;;  %1020 = vperm.xlu1 %2300, %v978_v16  }
  0x74   : > { %1015 = vperm.xlu0 %2299, %v977_v17   ;;  %1010 = vperm.xlu1 %2300, %v976_v18  }
  0x78   : > { %1165 = vperm.xlu0 %2299, %v1007_v19   ;;  %1160 = vperm.xlu1 %2300, %v1006_v20  }
  0x7c   : > { %1155 = vperm.xlu0 %2299, %v1005_v21   ;;  %1150 = vperm.xlu1 %2300, %v1004_v22  }
  0x80   : > { %1145 = vperm.xlu0 %2299, %v1003_v23   ;;  %1140 = vperm.xlu1 %2300, %v1002_v24  }
  0x84   : > { %1135 = vperm.xlu0 %2299, %v1001_v25   ;;  %1130 = vperm.xlu1 %2300, %v1000_v26  }
  0x88   : > { %1125 = vperm.xlu0 %2299, %v999_v28   ;;  %1120 = vperm.xlu1 %2300, %v998_v29  }
  0x8c   : > { %1115 = vperm.xlu0 %2299, %v997_v30   ;;  %1110 = vperm.xlu1 %2300, %v996_v31  }
  0x90   : > { %1105 = vperm.xlu0 %2299, %v995_v32   ;;  %1100 = vperm.xlu1 %2300, %v994_v33  }
  0x93   : > { %v472_v6 = vpop.permute.xlu0 %471  ;;  %v462_v7 = vpop.permute.xlu1 %461 }
  0x94   : > { %1095 = vperm.xlu0 %2299, %v993_v34   ;;  %1090 = vperm.xlu1 %2300, %v992_v35  }
  0x97   : > { %v467_v9 = vpop.permute.xlu0 %466  ;;  %v457_v11 = vpop.permute.xlu1 %456 }
  0x98   : > { %1678 = vperm.xlu0 %2299, %v1520_v36   ;;  %1598 = vperm.xlu1 %2300, %v1504_v37  }
  0x9b   : > { %v452_v14 = vpop.permute.xlu0 %451  ;;  %v447_v16 = vpop.permute.xlu1 %446 }
  0x9c   : > { %1673 = vperm.xlu0 %2299, %v1519_v38   ;;  %1593 = vperm.xlu1 %2300, %v1503_v39  }
  0x9f   : > { %v442_v19 = vpop.permute.xlu0 %441  ;;  %v437_v21 = vpop.permute.xlu1 %436 }
  0xa0   : > { %1668 = vperm.xlu0 %2299, %v1518_v40   ;;  %1588 = vperm.xlu1 %2300, %v1502_v41  }
  0xa3   : > { %v432_v24 = vpop.permute.xlu0 %431  ;;  %v427_v26 = vpop.permute.xlu1 %426 }
  0xa4   : > { %1663 = vperm.xlu0 %2299, %v1517_v42   ;;  %1583 = vperm.xlu1 %2300, %v1501_v43  }
  0xa7   : > { %v422_v30 = vpop.permute.xlu0 %421  ;;  %v417_v32 = vpop.permute.xlu1 %416 }
  0xa8   : > { %1658 = vperm.xlu0 %2299, %v1516_v44   ;;  %1578 = vperm.xlu1 %2300, %v1500_v45  }
  0xab   : > { %v412_v39 = vpop.permute.xlu0 %411  ;;  %v407_v43 = vpop.permute.xlu1 %406 }
  0xac   : > { %1653 = vperm.xlu0 %2299, %v1515_v46   ;;  %1573 = vperm.xlu1 %2300, %v1499_v47  }
  0xb0   : > { %1648 = vperm.xlu0 %2299, %v1514_v48   ;;  %1568 = vperm.xlu1 %2300, %v1498_v49  }
  0xb4   : > { %1643 = vperm.xlu0 %2299, %v1513_v50   ;;  %1563 = vperm.xlu1 %2300, %v1497_v51   ;;  %v402_v50 = vpop.permute.xlu0 %401 }
  0xb8   : > { %1638 = vperm.xlu0 %2299, %v1512_v52   ;;  %1558 = vperm.xlu1 %2300, %v1496_v53  }
  0xbc   : > { %1633 = vperm.xlu0 %2299, %v1511_v54   ;;  %1553 = vperm.xlu1 %2300, %v1495_v55   ;;  %v397_v54 = vpop.permute.xlu1 %396 }
  0xc0   : > { %1628 = vperm.xlu0 %2299, %v1510_v56   ;;  %1548 = vperm.xlu1 %2300, %v1494_v57  }
  0xc4   : > { %1623 = vperm.xlu0 %2299, %v1509_v59   ;;  %1543 = vperm.xlu1 %2300, %v1493_v60  }
  0xc8   : > { %1618 = vperm.xlu0 %2299, %v1508_v61   ;;  %1538 = vperm.xlu1 %2300, %v1492_v62   ;;  %v552_v61 = vpop.permute.xlu0 %551 }
  0xcc   : > { %1613 = vperm.xlu0 %2299, %v1507_v63   ;;  %1533 = vperm.xlu1 %2300, %v1491_v0  }
  0xd0   : > { %1608 = vperm.xlu0 %2299, %v1506_v1   ;;  %1528 = vperm.xlu1 %2300, %v1490_v2   ;;  %v547_v1 = vpop.permute.xlu1 %546 }
  0xd4   : > { %1603 = vperm.xlu0 %2299, %v1505_v3   ;;  %1523 = vperm.xlu1 %2300, %v1489_v4  }
  0xd8   : > { %1942 = vperm.xlu0 %2299, %v1939_v5  }
  0xdf   : > { %v2893_v8 = vpop.f32.mrf.mxu0 }
  0xe1   : > { %v2895_v10 = vpop.f32.mrf.mxu0 }
  0xe3   : > { %v2897_v12 = vpop.f32.mrf.mxu0 }
  0xe5   : > { %v2899_v13 = vpop.f32.mrf.mxu0 }
  0xe7   : > { %v2901_v15 = vpop.f32.mrf.mxu0 }
  0xe8   : > { %v747_v3 = vadd.f32 %v2901_v15, %v422_v30  ;;  %v732_v15 = vadd.f32 %v2899_v13, %v407_v43 }
  0xe9   : > { %v2903_v17 = vpop.f32.mrf.mxu0 }
  0xeb   : > { %v2221_v18 = vpop.f32.mrf.mxu0 }
  0xec   : > { %v757_v59 = vadd.f32 %v2221_v18, %v432_v24  ;;  %v537_v18 = vpop.permute.xlu1 %536 }
  0xed   : > { %v751_v20 = vpop.f32.mrf.mxu0 }
  0xee   : > { %v752_v63 = vadd.f32 %v751_v20, %v427_v26  ;;  %v887_v4 = vmax.f32 %v757_v59, 0.0 }
  0xef   : > { %v2224_v22 = vpop.f32.mrf.mxu0 }
  0xf0   : > { %v767_v52 = vadd.f32 %v2224_v22, %v442_v19  ;;  %v527_v26 = vpop.permute.xlu1 %526 }
  0xf1   : > { %v761_v23 = vpop.f32.mrf.mxu0 }
  0xf2   : > { %v762_v56 = vadd.f32 %v761_v23, %v437_v21  ;;  %v889_v60 = vmax.f32 %v767_v52, 0.0 }
  0xf3   : > { %v2227_v25 = vpop.f32.mrf.mxu0 }
  0xf4   : > { %v777_v45 = vadd.f32 %v2227_v25, %v452_v14  ;;  %v888_v0 = vmax.f32 %v762_v56, 0.0  ;;  %v737_v14 = vadd.f32 %v2897_v12, %v412_v39  ;;  %v722_v12 = vadd.f32 %v2895_v10, %v397_v54 }
  0xf5   : > { %v771_v28 = vpop.f32.mrf.mxu0  ;;  %v882_v25 = vmax.f32 %v732_v15, 0.0  ;;  %v918_v15 = vld [vmem:[%s3534_s3 + $0x30] sm:$0xff] }
  0xf6   : > { %v772_v48 = vadd.f32 %v771_v28, %v447_v16  ;;  %v891_v53 = vmax.f32 %v777_v45, 0.0  ;;  %v885_v16 = vmax.f32 %v747_v3, 0.0  ;;  %v883_v22 = vmax.f32 %v737_v14, 0.0  ;;  %v914_v14 = vld [vmem:[%s3534_s3 + $0x10] sm:$0xff] }
  0xf7   : > { %v2230_v29 = vpop.f32.mrf.mxu0 }
  0xf8   : > { %v787_v36 = vadd.f32 %v2230_v29, %v462_v7  ;;  %v890_v57 = vmax.f32 %v772_v48, 0.0  ;;  %v886_v7 = vmax.f32 %v752_v63, 0.0 }
  0xf9   : > { %v781_v31 = vpop.f32.mrf.mxu0 }
  0xfa   : > { %v782_v41 = vadd.f32 %v781_v31, %v457_v11  ;;  %v893_v46 = vmax.f32 %v787_v36, 0.0 }
  0xfb   : > { %v2233_v33 = vpop.f32.mrf.mxu0 }
  0xfc   : > { %v797_v34 = vadd.f32 %v2233_v33, %v472_v6  ;;  %v892_v49 = vmax.f32 %v782_v41, 0.0  ;;  %v742_v6 = vadd.f32 %v2903_v17, %v417_v32  ;;  %v727_v17 = vadd.f32 %v2893_v8, %v402_v50 }
  0xfd   : > { %v791_v35 = vpop.f32.mrf.mxu0  ;;  %v880_v8 = vmax.f32 %v722_v12, 0.0  ;;  %v927_v12 = vld [vmem:[%s3534_s3 + $0x78] sm:$0xff] }
  0xfe   : > { %v895_v37 = vmax.f32 %v797_v34, 0.0  ;;  %v792_v38 = vadd.f32 %v791_v35, %v467_v9  ;;  %v542_v9 = vpop.permute.xlu0 %541  ;;  %v884_v20 = vmax.f32 %v742_v6, 0.0  ;;  %v881_v13 = vmax.f32 %v727_v17, 0.0  ;;  %v517_v35 = vpop.permute.xlu1 %516  ;;  %v923_v17 = vld [vmem:[%s3534_s3 + $0x58] sm:$0xff] }
  0xff   : > { %v2905_v40 = vpop.f32.mrf.mxu0 }
 0x100   : > { %v894_v42 = vmax.f32 %v792_v38, 0.0  ;;  %1169 = vmatpush1.msra.mxu1 %v895_v37 }
 0x101   : > { %v2907_v44 = vpop.f32.mrf.mxu0  ;;  %1170 = vmatprep.subr.mxu1 %v2364_v27 }
 0x102   : > { %1171 = vmatpush1.msra.mxu1 %v894_v42  ;;  %v532_v23 = vpop.permute.xlu0 %531  ;;  %v507_v45 = vpop.permute.xlu1 %506 }
 0x103   : > { %v2910_v47 = vpop.f32.mrf.mxu0  ;;  %1172 = vmatprep.subr.mxu1 %v2364_v27 }
 0x104   : > { %1173 = vmatpush1.msra.mxu1 %v893_v46 }
 0x105   : > { %v2913_v51 = vpop.f32.mrf.mxu0  ;;  %1174 = vmatprep.subr.mxu1 %v2364_v27 }
 0x106   : > { %1175 = vmatpush1.msra.mxu1 %v892_v49  ;;  %v522_v31 = vpop.permute.xlu0 %521  ;;  %v497_v56 = vpop.permute.xlu1 %496 }
 0x107   : > { %v2916_v55 = vpop.f32.mrf.mxu0  ;;  %1176 = vmatprep.subr.mxu1 %v2364_v27 }
 0x108   : > { %1177 = vmatpush1.msra.mxu1 %v891_v53 }
 0x109   : > { %v2919_v58 = vpop.f32.mrf.mxu0  ;;  %1178 = vmatprep.subr.mxu1 %v2364_v27 }
 0x10a   : > { %1179 = vmatpush1.msra.mxu1 %v890_v57  ;;  %v512_v41 = vpop.permute.xlu0 %511 }
 0x10b   : > { %v2922_v62 = vpop.f32.mrf.mxu0  ;;  %1180 = vmatprep.subr.mxu1 %v2364_v27 }
 0x10c   : > { %1181 = vmatpush1.msra.mxu1 %v889_v60  ;;  %v837_v53 = vadd.f32 %v2922_v62, %v512_v41  ;;  %v822_v62 = vadd.f32 %v2919_v58, %v497_v56  ;;  %v945_v41 = vld [vmem:[%s3534_s3 + $0x108] sm:$0xff]  ;;  %v954_v56 = vld [vmem:[%s3534_s3 + $0x150] sm:$0xff] }
 0x10d   : > { %v2925_v2 = vpop.f32.mrf.mxu0  ;;  %1182 = vmatprep.subr.mxu1 %v2364_v27 }
 0x10e   : > { %1183 = vmatpush1.msra.mxu1 %v888_v0  ;;  %v502_v52 = vpop.permute.xlu0 %501  ;;  %v832_v57 = vadd.f32 %v2925_v2, %v507_v45  ;;  %v946_v45 = vld [vmem:[%s3534_s3 + $0x110] sm:$0xff] }
 0x10f   : > { %v2248_v5 = vpop.f32.mrf.mxu0  ;;  %1184 = vmatprep.subr.mxu1 %v2364_v27  ;;  %v827_v60 = vadd.f32 %v2916_v55, %v502_v52  ;;  %v953_v52 = vld [vmem:[%s3534_s3 + $0x148] sm:$0xff] }
 0x110   : > { %1185 = vmatpush1.msra.mxu1 %v887_v4  ;;  %v847_v46 = vadd.f32 %v2248_v5, %v522_v31  ;;  %v902_v0 = vmax.f32 %v832_v57, 0.0  ;;  %v900_v4 = vmax.f32 %v822_v62, 0.0  ;;  %v935_v31 = vld [vmem:[%s3534_s3 + $0xb8] sm:$0xff]  ;;  %v957_v57 = vld [vmem:[%s3534_s3 + $0x168] sm:$0xff]  ;;  %v960_v62 = vld [vmem:[%s3534_s3 + $0x180] sm:$0xff] }
 0x111   : > { %v841_v11 = vpop.f32.mrf.mxu0  ;;  %1186 = vmatprep.subr.mxu1 %v2364_v27  ;;  %v901_v3 = vmax.f32 %v827_v60, 0.0  ;;  %v959_v60 = vld [vmem:[%s3534_s3 + $0x178] sm:$0xff] }
 0x112   : > { %1187 = vmatpush1.msra.mxu1 %v886_v7  ;;  %v842_v49 = vadd.f32 %v841_v11, %v517_v35  ;;  %v905_v54 = vmax.f32 %v847_v46, 0.0  ;;  %v492_v63 = vpop.permute.xlu0 %491  ;;  %v938_v35 = vld [vmem:[%s3534_s3 + $0xd0] sm:$0xff]  ;;  %v949_v46 = vld [vmem:[%s3534_s3 + $0x128] sm:$0xff] }
 0x113   : > { %v2251_v19 = vpop.f32.mrf.mxu0  ;;  %1188 = vmatprep.subr.mxu1 %v2364_v27  ;;  %v817_v2 = vadd.f32 %v2910_v47, %v492_v63  ;;  %v961_v63 = vld [vmem:[%s3534_s3 + $0x188] sm:$0xff] }
 0x114   : > { %1189 = vmatpush1.msra.mxu1 %v885_v16  ;;  %v857_v38 = vadd.f32 %v2251_v19, %v532_v23  ;;  %v904_v59 = vmax.f32 %v842_v49, 0.0  ;;  %v917_v16 = vld [vmem:[%s3534_s3 + $0x28] sm:$0xff]  ;;  %v919_v19 = vld [vmem:[%s3534_s3 + $0x38] sm:$0xff] }
 0x115   : > { %v851_v21 = vpop.f32.mrf.mxu0  ;;  %1190 = vmatprep.subr.mxu1 %v2364_v27  ;;  %v899_v6 = vmax.f32 %v817_v2, 0.0  ;;  %v925_v23 = vld [vmem:[%s3534_s3 + $0x68] sm:$0xff]  ;;  %v951_v49 = vld [vmem:[%s3534_s3 + $0x138] sm:$0xff] }
 0x116   : > { %1191 = vmatpush1.msra.mxu1 %v884_v20  ;;  %v852_v42 = vadd.f32 %v851_v21, %v527_v26  ;;  %v907_v48 = vmax.f32 %v857_v38, 0.0  ;;  %v482_v5 = vpop.permute.xlu0 %481  ;;  %v921_v20 = vld [vmem:[%s3534_s3 + $0x48] sm:$0xff]  ;;  %v920_v21 = vld [vmem:[%s3534_s3 + $0x40] sm:$0xff]  ;;  %v943_v38 = vld [vmem:[%s3534_s3 + $0xf8] sm:$0xff] }
 0x117   : > { %v2254_v24 = vpop.f32.mrf.mxu0  ;;  %1192 = vmatprep.subr.mxu1 %v2364_v27  ;;  %v807_v58 = vadd.f32 %v2905_v40, %v482_v5  ;;  %v912_v40 = vld [vmem:[%s3534_s3] sm:$0xff]  ;;  %v929_v26 = vld [vmem:[%s3534_s3 + $0x88] sm:$0xff] }
 0x118   : > { %1193 = vmatpush1.msra.mxu1 %v883_v22  ;;  %v867_v33 = vadd.f32 %v2254_v24, %v542_v9  ;;  %v906_v50 = vmax.f32 %v852_v42, 0.0  ;;  %v922_v22 = vld [vmem:[%s3534_s3 + $0x50] sm:$0xff]  ;;  %v924_v24 = vld [vmem:[%s3534_s3 + $0x60] sm:$0xff]  ;;  %v965_v2 = vld [vmem:[%s3534_s3 + $0x1a8] sm:$0xff] }
 0x119   : > { %v861_v28 = vpop.f32.mrf.mxu0  ;;  %1194 = vmatprep.subr.mxu1 %v2364_v27  ;;  %v897_v11 = vmax.f32 %v807_v58, 0.0  ;;  %v944_v42 = vld [vmem:[%s3534_s3 + $0x100] sm:$0xff]  ;;  %v969_v5 = vld [vmem:[%s3534_s3 + $0x1c8] sm:$0xff] }
 0x11a   : > { %1195 = vmatpush1.msra.mxu1 %v882_v25  ;;  %v862_v36 = vadd.f32 %v861_v28, %v537_v18  ;;  %v909_v39 = vmax.f32 %v867_v33, 0.0  ;;  %v916_v18 = vld [vmem:[%s3534_s3 + $0x20] sm:$0xff]  ;;  %v926_v25 = vld [vmem:[%s3534_s3 + $0x70] sm:$0xff]  ;;  %v937_v33 = vld [vmem:[%s3534_s3 + $0xc8] sm:$0xff] }
 0x11b   : > { %v2257_v29 = vpop.f32.mrf.mxu0  ;;  %1196 = vmatprep.subr.mxu1 %v2364_v27  ;;  %v928_v28 = vld [vmem:[%s3534_s3 + $0x80] sm:$0xff] }
 0x11c   : > { %v877_v30 = vadd.f32 %v2257_v29, %v552_v61  ;;  %1197 = vmatpush1.msra.mxu1 %v881_v13  ;;  %v908_v43 = vmax.f32 %v862_v36, 0.0  ;;  %v903_v61 = vmax.f32 %v837_v53, 0.0  ;;  %v931_v13 = vld [vmem:[%s3534_s3 + $0x98] sm:$0xff]  ;;  %v930_v29 = vld [vmem:[%s3534_s3 + $0x90] sm:$0xff]  ;;  %v941_v36 = vld [vmem:[%s3534_s3 + $0xe8] sm:$0xff] }
 0x11d   : > { %v871_v32 = vpop.f32.mrf.mxu0  ;;  %1198 = vmatprep.subr.mxu1 %v2364_v27  ;;  %v952_v53 = vld [vmem:[%s3534_s3 + $0x140] sm:$0xff] }
 0x11e   : > { %v911_v10 = vmax.f32 %v877_v30, 0.0  ;;  %v872_v34 = vadd.f32 %v871_v32, %v547_v1  ;;  %1199 = vmatpush1.msra.mxu1 %v880_v8  ;;  %v487_v1 = vpop.permute.xlu1 %486  ;;  %v933_v8 = vld [vmem:[%s3534_s3 + $0xa8] sm:$0xff]  ;;  %v932_v30 = vld [vmem:[%s3534_s3 + $0xa0] sm:$0xff]  ;;  %v934_v32 = vld [vmem:[%s3534_s3 + $0xb0] sm:$0xff] }
 0x11f   : > { %1200 = vmatprep.subr.mxu1 %v2364_v27  ;;  %v812_v55 = vadd.f32 %v2913_v51, %v487_v1  ;;  %v962_v1 = vld [vmem:[%s3534_s3 + $0x190] sm:$0xff]  ;;  %v968_v58 = vld [vmem:[%s3534_s3 + $0x1c0] sm:$0xff] }
 0x120   : > { %v910_v37 = vmax.f32 %v872_v34, 0.0  ;;  %1201 = vmatpush2.msra.mxu1 %v911_v10  ;;  %v936_v10 = vld [vmem:[%s3534_s3 + $0xc0] sm:$0xff]  ;;  %v939_v34 = vld [vmem:[%s3534_s3 + $0xd8] sm:$0xff] }
 0x121   : > { %1202 = vmatprep.subr.mxu1 %v2364_v27  ;;  %v898_v9 = vmax.f32 %v812_v55, 0.0  ;;  %v967_v55 = vld [vmem:[%s3534_s3 + $0x1b8] sm:$0xff] }
 0x122   : > { %1203 = vmatpush2.msra.mxu1 %v910_v37  ;;  %v477_v7 = vpop.permute.xlu1 %476  ;;  %v940_v37 = vld [vmem:[%s3534_s3 + $0xe0] sm:$0xff] }
 0x123   : > { %1204 = vmatprep.subr.mxu1 %v2364_v27  ;;  %v802_v47 = vadd.f32 %v2907_v44, %v477_v7  ;;  %v915_v44 = vld [vmem:[%s3534_s3 + $0x18] sm:$0xff]  ;;  %v970_v7 = vld [vmem:[%s3534_s3 + $0x1d0] sm:$0xff] }
 0x124   : > { %1205 = vmatpush2.msra.mxu1 %v909_v39  ;;  %v942_v39 = vld [vmem:[%s3534_s3 + $0xf0] sm:$0xff] }
 0x125   : > { %1206 = vmatprep.subr.mxu1 %v2364_v27  ;;  %v896_v51 = vmax.f32 %v802_v47, 0.0  ;;  %v973_v47 = vld [vmem:[%s3534_s3 + $0x1e8] sm:$0xff] }
 0x126   : > { %1207 = vmatpush2.msra.mxu1 %v908_v43  ;;  %v947_v43 = vld [vmem:[%s3534_s3 + $0x118] sm:$0xff] }
 0x127   : > { %1208 = vmatprep.subr.mxu1 %v2364_v27 }
 0x128   : > { %1209 = vmatpush2.msra.mxu1 %v907_v48  ;;  %v948_v48 = vld [vmem:[%s3534_s3 + $0x120] sm:$0xff] }
 0x129   : > { %1210 = vmatprep.subr.mxu1 %v2364_v27 }
 0x12a   : > { %1211 = vmatpush2.msra.mxu1 %v906_v50  ;;  %v950_v50 = vld [vmem:[%s3534_s3 + $0x130] sm:$0xff] }
 0x12b   : > { %1212 = vmatprep.subr.mxu1 %v2364_v27 }
 0x12c   : > { %1213 = vmatpush2.msra.mxu1 %v905_v54  ;;  %v955_v54 = vld [vmem:[%s3534_s3 + $0x158] sm:$0xff] }
 0x12d   : > { %1214 = vmatprep.subr.mxu1 %v2364_v27 }
 0x12e   : > { %1215 = vmatpush2.msra.mxu1 %v904_v59  ;;  %v956_v59 = vld [vmem:[%s3534_s3 + $0x160] sm:$0xff] }
 0x12f   : > { %1216 = vmatprep.subr.mxu1 %v2364_v27 }
 0x130   : > { %1217 = vmatpush2.msra.mxu1 %v903_v61  ;;  %v958_v61 = vld [vmem:[%s3534_s3 + $0x170] sm:$0xff] }
 0x131   : > { %1218 = vmatprep.subr.mxu1 %v2364_v27 }
 0x132   : > { %1219 = vmatpush2.msra.mxu1 %v902_v0  ;;  %v963_v0 = vld [vmem:[%s3534_s3 + $0x198] sm:$0xff] }
 0x133   : > { %1220 = vmatprep.subr.mxu1 %v2364_v27 }
 0x134   : > { %1221 = vmatpush2.msra.mxu1 %v901_v3  ;;  %v964_v3 = vld [vmem:[%s3534_s3 + $0x1a0] sm:$0xff] }
 0x135   : > { %1222 = vmatprep.subr.mxu1 %v2364_v27 }
 0x136   : > { %1223 = vmatpush2.msra.mxu1 %v900_v4  ;;  %v966_v4 = vld [vmem:[%s3534_s3 + $0x1b0] sm:$0xff] }
 0x137   : > { %1224 = vmatprep.subr.mxu1 %v2364_v27 }
 0x138   : > { %1225 = vmatpush2.msra.mxu1 %v899_v6  ;;  %v971_v6 = vld [vmem:[%s3534_s3 + $0x1d8] sm:$0xff] }
 0x139   : > { %1226 = vmatprep.subr.mxu1 %v2364_v27 }
 0x13a   : > { %1227 = vmatpush2.msra.mxu1 %v898_v9  ;;  %v972_v9 = vld [vmem:[%s3534_s3 + $0x1e0] sm:$0xff] }
 0x13b   : > { %1228 = vmatprep.subr.mxu1 %v2364_v27 }
 0x13c   : > { %1229 = vmatpush2.msra.mxu1 %v897_v11  ;;  %v975_v11 = vld [vmem:[%s3534_s3 + $0x1f8] sm:$0xff] }
 0x13d   : > { %1230 = vmatprep.subr.mxu1 %v2364_v27 }
 0x13e   : > { %1231 = vmatpush2.msra.mxu1 %v896_v51  ;;  %v974_v51 = vld [vmem:[%s3534_s3 + $0x1f0] sm:$0xff] }
 0x13f   : > { %1233 = vmatmul.mubr.f32.vlgmr.msra.gmra.mxu1 %v912_v40 }
 0x140   : > { %1237 = vmatprep.mubr.f32.mxu1 %v915_v44 }
 0x143   : > { %1238 = vmatmul.mubr.f32.gmra.mxu1 %v914_v14 }
 0x144   : > { %1242 = vmatprep.mubr.f32.mxu1 %v917_v16 }
 0x147   : > { %1243 = vmatmul.mubr.f32.gmra.mxu1 %v916_v18 }
 0x148   : > { %1247 = vmatprep.mubr.f32.mxu1 %v919_v19 }
 0x14b   : > { %1248 = vmatmul.mubr.f32.gmra.mxu1 %v918_v15 }
 0x14c   : > { %1252 = vmatprep.mubr.f32.mxu1 %v921_v20 }
 0x14f   : > { %1253 = vmatmul.mubr.f32.gmra.mxu1 %v920_v21 }
 0x150   : > { %1257 = vmatprep.mubr.f32.mxu1 %v923_v17 }
 0x153   : > { %1258 = vmatmul.mubr.f32.gmra.mxu1 %v922_v22 }
 0x154   : > { %1262 = vmatprep.mubr.f32.mxu1 %v925_v23 }
 0x157   : > { %1263 = vmatmul.mubr.f32.gmra.mxu1 %v924_v24 }
 0x158   : > { %1267 = vmatprep.mubr.f32.mxu1 %v927_v12 }
 0x15b   : > { %1268 = vmatmul.mubr.f32.gmra.mxu1 %v926_v25 }
 0x15c   : > { %1272 = vmatprep.mubr.f32.mxu1 %v929_v26 }
 0x15f   : > { %1273 = vmatmul.mubr.f32.gmra.mxu1 %v928_v28  ;;  %v1426_v28 = vld [vmem:[%s3536_s5 + $0x8] sm:$0xff] }
 0x160   : > { %1277 = vmatprep.mubr.f32.mxu1 %v931_v13  ;;  %1745 = vmatprep.mubr.f32.mxu0 %v1426_v28 }
 0x163   : > { %1278 = vmatmul.mubr.f32.gmra.mxu1 %v930_v29 }
 0x164   : > { %1282 = vmatprep.mubr.f32.mxu1 %v933_v8 }
 0x167   : > { %1283 = vmatmul.mubr.f32.gmra.mxu1 %v932_v30 }
 0x168   : > { %1287 = vmatprep.mubr.f32.mxu1 %v935_v31 }
 0x16b   : > { %1288 = vmatmul.mubr.f32.gmra.mxu1 %v934_v32 }
 0x16c   : > { %1292 = vmatprep.mubr.f32.mxu1 %v937_v33  ;;  %v1086_v33 = vpop.permute.xlu0 %1085 }
 0x16f   : > { %1293 = vmatmul.mubr.f32.gmra.mxu1 %v936_v10 }
 0x170   : > { %1297 = vmatprep.mubr.f32.mxu1 %v939_v34  ;;  %v1081_v34 = vpop.permute.xlu1 %1080 }
 0x173   : > { %1298 = vmatmul.mubr.f32.gmra.mxu1 %v938_v35 }
 0x174   : > { %1302 = vmatprep.mubr.f32.mxu1 %v941_v36 }
 0x177   : > { %1303 = vmatmul.mubr.f32.gmra.mxu1 %v940_v37  ;;  %v1076_v37 = vpop.permute.xlu0 %1075 }
 0x178   : > { %1307 = vmatprep.mubr.f32.mxu1 %v943_v38 }
 0x17b   : > { %1308 = vmatmul.mubr.f32.gmra.mxu1 %v942_v39  ;;  %v1071_v39 = vpop.permute.xlu1 %1070 }
 0x17c   : > { %1312 = vmatprep.mubr.f32.mxu1 %v945_v41 }
 0x17f   : > { %1313 = vmatmul.mubr.f32.gmra.mxu1 %v944_v42 }
 0x180   : > { %1317 = vmatprep.mubr.f32.mxu1 %v947_v43  ;;  %v1066_v43 = vpop.permute.xlu0 %1065 }
 0x183   : > { %1318 = vmatmul.mubr.f32.gmra.mxu1 %v946_v45 }
 0x184   : > { %1322 = vmatprep.mubr.f32.mxu1 %v949_v46  ;;  %v1061_v46 = vpop.permute.xlu1 %1060 }
 0x187   : > { %1323 = vmatmul.mubr.f32.gmra.mxu1 %v948_v48 }
 0x188   : > { %1327 = vmatprep.mubr.f32.mxu1 %v951_v49 }
 0x18b   : > { %1328 = vmatmul.mubr.f32.gmra.mxu1 %v950_v50 }
 0x18c   : > { %1332 = vmatprep.mubr.f32.mxu1 %v953_v52 }
 0x18f   : > { %1333 = vmatmul.mubr.f32.gmra.mxu1 %v952_v53  ;;  %v1056_v53 = vpop.permute.xlu0 %1055 }
 0x190   : > { %1337 = vmatprep.mubr.f32.mxu1 %v955_v54 }
 0x193   : > { %1338 = vmatmul.mubr.f32.gmra.mxu1 %v954_v56 }
 0x194   : > { %1342 = vmatprep.mubr.f32.mxu1 %v957_v57 }
 0x197   : > { %1343 = vmatmul.mubr.f32.gmra.mxu1 %v956_v59  ;;  %v1051_v59 = vpop.permute.xlu1 %1050 }
 0x198   : > { %1347 = vmatprep.mubr.f32.mxu1 %v959_v60 }
 0x19b   : > { %1348 = vmatmul.mubr.f32.gmra.mxu1 %v958_v61 }
 0x19c   : > { %1352 = vmatprep.mubr.f32.mxu1 %v961_v63 }
 0x19f   : > { %1353 = vmatmul.mubr.f32.gmra.mxu1 %v960_v62 }
 0x1a0   : > { %1357 = vmatprep.mubr.f32.mxu1 %v963_v0 }
 0x1a3   : > { %1358 = vmatmul.mubr.f32.gmra.mxu1 %v962_v1 }
 0x1a4   : > { %1362 = vmatprep.mubr.f32.mxu1 %v965_v2  ;;  %v1046_v2 = vpop.permute.xlu0 %1045 }
 0x1a7   : > { %1363 = vmatmul.mubr.f32.gmra.mxu1 %v964_v3 }
 0x1a8   : > { %1367 = vmatprep.mubr.f32.mxu1 %v967_v55 }
 0x1ab   : > { %1368 = vmatmul.mubr.f32.gmra.mxu1 %v966_v4 }
 0x1ac   : > { %1372 = vmatprep.mubr.f32.mxu1 %v969_v5  ;;  %v1041_v5 = vpop.permute.xlu1 %1040 }
 0x1af   : > { %1373 = vmatmul.mubr.f32.gmra.mxu1 %v968_v58 }
 0x1b0   : > { %1377 = vmatprep.mubr.f32.mxu1 %v971_v6 }
 0x1b3   : > { %1378 = vmatmul.mubr.f32.gmra.mxu1 %v970_v7 }
 0x1b4   : > { %1382 = vmatprep.mubr.f32.mxu1 %v973_v47 }
 0x1b7   : > { %1383 = vmatmul.mubr.f32.gmra.mxu1 %v972_v9 }
 0x1b8   : > { %1387 = vmatprep.mubr.f32.mxu1 %v975_v11 }
 0x1bb   : > { %1388 = vmatmul.mubr.f32.gmra.mxu1 %v974_v51  ;;  %v1036_v51 = vpop.permute.xlu0 %1035 }
 0x1ff   : > { %v3155_v40 = vpop.f32.mrf.mxu1 }
 0x201   : > { %v1236_v44 = vpop.f32.mrf.mxu1 }
 0x203   : > { %v3157_v14 = vpop.f32.mrf.mxu1 }
 0x205   : > { %v1241_v16 = vpop.f32.mrf.mxu1 }
 0x207   : > { %v3159_v18 = vpop.f32.mrf.mxu1 }
 0x209   : > { %v1246_v19 = vpop.f32.mrf.mxu1 }
 0x20b   : > { %v3161_v15 = vpop.f32.mrf.mxu1 }
 0x20d   : > { %v1251_v20 = vpop.f32.mrf.mxu1 }
 0x20e   : > { %v1031_v20 = vpop.permute.xlu1 %1030 }
 0x20f   : > { %v3163_v21 = vpop.f32.mrf.mxu1 }
 0x211   : > { %v1256_v17 = vpop.f32.mrf.mxu1 }
 0x213   : > { %v3165_v22 = vpop.f32.mrf.mxu1 }
 0x214   : > { %v1260_v28 = vadd.f32 %v3165_v22, %v1036_v51 }
 0x215   : > { %v1261_v23 = vpop.f32.mrf.mxu1 }
 0x217   : > { %v3167_v24 = vpop.f32.mrf.mxu1 }
 0x218   : > { %v1265_v23 = vadd.f32 %v3167_v24, %v1041_v5 }
 0x219   : > { %v1266_v12 = vpop.f32.mrf.mxu1 }
 0x21b   : > { %v1269_v25 = vpop.f32.mrf.mxu1 }
 0x21c   : > { %v1270_v16 = vadd.f32 %v1269_v25, %v1046_v2 }
 0x21d   : > { %v1271_v26 = vpop.f32.mrf.mxu1 }
 0x21f   : > { %v1274_v13 = vpop.f32.mrf.mxu1 }
 0x220   : > { %v1275_v9 = vadd.f32 %v1274_v13, %v1051_v59  ;;  %v1400_v13 = vmax.f32 %v1270_v16, 0.0 }
 0x221   : > { %v1276_v29 = vpop.f32.mrf.mxu1 }
 0x222   : > { %v1401_v12 = vmax.f32 %v1275_v9, 0.0  ;;  %v1026_v29 = vpop.permute.xlu0 %1025 }
 0x223   : > { %v1279_v8 = vpop.f32.mrf.mxu1 }
 0x224   : > { %v1280_v6 = vadd.f32 %v1279_v8, %v1056_v53  ;;  %v1255_v8 = vadd.f32 %v3163_v21, %v1031_v20 }
 0x225   : > { %v1281_v30 = vpop.f32.mrf.mxu1 }
 0x226   : > { %v1402_v19 = vmax.f32 %v1280_v6, 0.0  ;;  %v1399_v30 = vmax.f32 %v1265_v23, 0.0 }
 0x227   : > { %v1284_v31 = vpop.f32.mrf.mxu1 }
 0x228   : > { %v1285_v55 = vadd.f32 %v1284_v31, %v1061_v46  ;;  %v1021_v31 = vpop.permute.xlu1 %1020 }
 0x229   : > { %v1286_v32 = vpop.f32.mrf.mxu1 }
 0x22a   : > { %v1403_v11 = vmax.f32 %v1285_v55, 0.0  ;;  %v1250_v32 = vadd.f32 %v3161_v15, %v1026_v29 }
 0x22b   : > { %v1289_v10 = vpop.f32.mrf.mxu1 }
 0x22c   : > { %v1290_v0 = vadd.f32 %v1289_v10, %v1066_v43  ;;  %v1245_v10 = vadd.f32 %v3159_v18, %v1021_v31 }
 0x22d   : > { %v1291_v35 = vpop.f32.mrf.mxu1 }
 0x22e   : > { %v1404_v7 = vmax.f32 %v1290_v0, 0.0  ;;  %v1016_v35 = vpop.permute.xlu0 %1015 }
 0x22f   : > { %v1294_v36 = vpop.f32.mrf.mxu1 }
 0x230   : > { %v1295_v61 = vadd.f32 %v1294_v36, %v1071_v39  ;;  %v1240_v36 = vadd.f32 %v3157_v14, %v1016_v35 }
 0x231   : > { %v1296_v38 = vpop.f32.mrf.mxu1 }
 0x232   : > { %v1405_v4 = vmax.f32 %v1295_v61, 0.0  ;;  %v1011_v38 = vpop.permute.xlu1 %1010  ;;  %v1166_v53 = vpop.permute.xlu0 %1165 }
 0x233   : > { %v1299_v41 = vpop.f32.mrf.mxu1  ;;  %v1235_v39 = vadd.f32 %v3155_v40, %v1011_v38 }
 0x234   : > { %v1300_v56 = vadd.f32 %v1299_v41, %v1076_v37  ;;  %v1396_v37 = vmax.f32 %v1250_v32, 0.0  ;;  %v1395_v41 = vmax.f32 %v1245_v10, 0.0 }
 0x235   : > { %v1301_v42 = vpop.f32.mrf.mxu1  ;;  %v1393_v14 = vmax.f32 %v1235_v39, 0.0 }
 0x236   : > { %v1406_v1 = vmax.f32 %v1300_v56, 0.0  ;;  %v1394_v42 = vmax.f32 %v1240_v36, 0.0  ;;  %v1161_v56 = vpop.permute.xlu1 %1160  ;;  %v1156_v61 = vpop.permute.xlu0 %1155 }
 0x237   : > { %v1304_v45 = vpop.f32.mrf.mxu1 }
 0x238   : > { %v1305_v50 = vadd.f32 %v1304_v45, %v1081_v34  ;;  %v1397_v34 = vmax.f32 %v1255_v8, 0.0 }
 0x239   : > { %v1306_v48 = vpop.f32.mrf.mxu1 }
 0x23a   : > { %v1407_v63 = vmax.f32 %v1305_v50, 0.0  ;;  %v1146_v2 = vpop.permute.xlu0 %1145 }
 0x23b   : > { %v1309_v49 = vpop.f32.mrf.mxu1 }
 0x23c   : > { %v1310_v52 = vadd.f32 %v1309_v49, %v1086_v33  ;;  %v1398_v33 = vmax.f32 %v1260_v28, 0.0 }
 0x23d   : > { %v1311_v54 = vpop.f32.mrf.mxu1 }
 0x23e   : > { %v1408_v57 = vmax.f32 %v1310_v52, 0.0  ;;  %v1136_v9 = vpop.permute.xlu0 %1135 }
 0x23f   : > { %v3172_v60 = vpop.f32.mrf.mxu1 }
 0x240   : > { %1682 = vmatpush1.msra.mxu0 %v1408_v57 }
 0x241   : > { %v1316_v62 = vpop.f32.mrf.mxu1  ;;  %1683 = vmatprep.subr.mxu0 %v2364_v27 }
 0x242   : > { %1684 = vmatpush1.msra.mxu0 %v1407_v63  ;;  %v1151_v62 = vpop.permute.xlu1 %1150 }
 0x243   : > { %v3175_v3 = vpop.f32.mrf.mxu1  ;;  %1685 = vmatprep.subr.mxu0 %v2364_v27 }
 0x244   : > { %1686 = vmatpush1.msra.mxu0 %v1406_v1 }
 0x245   : > { %v1321_v58 = vpop.f32.mrf.mxu1  ;;  %1687 = vmatprep.subr.mxu0 %v2364_v27 }
 0x246   : > { %1688 = vmatpush1.msra.mxu0 %v1405_v4  ;;  %v1141_v4 = vpop.permute.xlu1 %1140 }
 0x247   : > { %v3179_v47 = vpop.f32.mrf.mxu1  ;;  %1689 = vmatprep.subr.mxu0 %v2364_v27 }
 0x248   : > { %1690 = vmatpush1.msra.mxu0 %v1404_v7 }
 0x249   : > { %v1326_v44 = vpop.f32.mrf.mxu1  ;;  %1691 = vmatprep.subr.mxu0 %v2364_v27 }
 0x24a   : > { %1692 = vmatpush1.msra.mxu0 %v1403_v11  ;;  %v1131_v16 = vpop.permute.xlu1 %1130 }
 0x24b   : > { %v3183_v17 = vpop.f32.mrf.mxu1  ;;  %1693 = vmatprep.subr.mxu0 %v2364_v27 }
 0x24c   : > { %1694 = vmatpush1.msra.mxu0 %v1402_v19 }
 0x24d   : > { %v1331_v26 = vpop.f32.mrf.mxu1  ;;  %1695 = vmatprep.subr.mxu0 %v2364_v27 }
 0x24e   : > { %1696 = vmatpush1.msra.mxu0 %v1401_v12  ;;  %v1126_v26 = vpop.permute.xlu0 %1125  ;;  %v1121_v29 = vpop.permute.xlu1 %1120 }
 0x24f   : > { %v3189_v25 = vpop.f32.mrf.mxu1  ;;  %1697 = vmatprep.subr.mxu0 %v2364_v27 }
 0x250   : > { %1698 = vmatpush1.msra.mxu0 %v1400_v13 }
 0x251   : > { %v1336_v24 = vpop.f32.mrf.mxu1  ;;  %1699 = vmatprep.subr.mxu0 %v2364_v27 }
 0x252   : > { %1700 = vmatpush1.msra.mxu0 %v1399_v30  ;;  %v1116_v32 = vpop.permute.xlu0 %1115 }
 0x253   : > { %v3195_v22 = vpop.f32.mrf.mxu1  ;;  %1701 = vmatprep.subr.mxu0 %v2364_v27 }
 0x254   : > { %1702 = vmatpush1.msra.mxu0 %v1398_v33  ;;  %v1340_v36 = vadd.f32 %v3195_v22, %v1116_v32  ;;  %v1465_v32 = vld [vmem:[%s3536_s5 + $0x140] sm:$0xff] }
 0x255   : > { %v1341_v21 = vpop.f32.mrf.mxu1  ;;  %1703 = vmatprep.subr.mxu0 %v2364_v27 }
 0x256   : > { %1704 = vmatpush1.msra.mxu0 %v1397_v34  ;;  %v1111_v34 = vpop.permute.xlu1 %1110  ;;  %v1106_v38 = vpop.permute.xlu0 %1105 }
 0x257   : > { %v3201_v15 = vpop.f32.mrf.mxu1  ;;  %1705 = vmatprep.subr.mxu0 %v2364_v27  ;;  %v1335_v39 = vadd.f32 %v3189_v25, %v1111_v34  ;;  %v1470_v34 = vld [vmem:[%s3536_s5 + $0x168] sm:$0xff] }
 0x258   : > { %1706 = vmatpush1.msra.mxu0 %v1396_v37  ;;  %v1345_v35 = vadd.f32 %v3201_v15, %v1121_v29  ;;  %v1330_v15 = vadd.f32 %v3183_v17, %v1106_v38  ;;  %v1462_v29 = vld [vmem:[%s3536_s5 + $0x128] sm:$0xff]  ;;  %v1473_v38 = vld [vmem:[%s3536_s5 + $0x180] sm:$0xff] }
 0x259   : > { %v1346_v18 = vpop.f32.mrf.mxu1  ;;  %1707 = vmatprep.subr.mxu0 %v2364_v27 }
 0x25a   : > { %1708 = vmatpush1.msra.mxu0 %v1395_v41  ;;  %v1415_v41 = vmax.f32 %v1345_v35, 0.0  ;;  %v1101_v18 = vpop.permute.xlu1 %1100  ;;  %v1469_v35 = vld [vmem:[%s3536_s5 + $0x160] sm:$0xff] }
 0x25b   : > { %v1349_v43 = vpop.f32.mrf.mxu1  ;;  %1709 = vmatprep.subr.mxu0 %v2364_v27  ;;  %v1325_v22 = vadd.f32 %v3179_v47, %v1101_v18  ;;  %v1478_v18 = vld [vmem:[%s3536_s5 + $0x1a8] sm:$0xff] }
 0x25c   : > { %1710 = vmatpush1.msra.mxu0 %v1394_v42  ;;  %v1350_v33 = vadd.f32 %v1349_v43, %v1126_v26  ;;  %v1414_v42 = vmax.f32 %v1340_v36, 0.0  ;;  %v1413_v43 = vmax.f32 %v1335_v39, 0.0  ;;  %v1457_v26 = vld [vmem:[%s3536_s5 + $0x100] sm:$0xff]  ;;  %v1471_v36 = vld [vmem:[%s3536_s5 + $0x170] sm:$0xff]  ;;  %v1476_v39 = vld [vmem:[%s3536_s5 + $0x198] sm:$0xff] }
 0x25d   : > { %v1351_v45 = vpop.f32.mrf.mxu1  ;;  %1711 = vmatprep.subr.mxu0 %v2364_v27 }
 0x25e   : > { %1712 = vmatpush1.msra.mxu0 %v1393_v14  ;;  %v1416_v37 = vmax.f32 %v1350_v33, 0.0  ;;  %v1096_v14 = vpop.permute.xlu0 %1095  ;;  %v1412_v45 = vmax.f32 %v1330_v15, 0.0  ;;  %v1468_v33 = vld [vmem:[%s3536_s5 + $0x158] sm:$0xff]  ;;  %v1477_v15 = vld [vmem:[%s3536_s5 + $0x1a0] sm:$0xff] }
 0x25f   : > { %v1354_v46 = vpop.f32.mrf.mxu1  ;;  %1713 = vmatprep.subr.mxu0 %v2364_v27  ;;  %v1320_v25 = vadd.f32 %v3175_v3, %v1096_v14  ;;  %v1425_v3 = vld [vmem:[%s3536_s5] sm:$0xff] }
 0x260   : > { %v1355_v31 = vadd.f32 %v1354_v46, %v1131_v16  ;;  %v1091_v46 = vpop.permute.xlu1 %1090  ;;  %v1454_v16 = vld [vmem:[%s3536_s5 + $0xe8] sm:$0xff]  ;;  %v1481_v14 = vld [vmem:[%s3536_s5 + $0x1c0] sm:$0xff] }
 0x261   : > { %v1356_v40 = vpop.f32.mrf.mxu1  ;;  %v1315_v17 = vadd.f32 %v3172_v60, %v1091_v46  ;;  %v1428_v60 = vld [vmem:[%s3536_s5 + $0x18] sm:$0xff]  ;;  %v1486_v46 = vld [vmem:[%s3536_s5 + $0x1e8] sm:$0xff] }
 0x262   : > { %v1417_v21 = vmax.f32 %v1355_v31, 0.0  ;;  %v1411_v40 = vmax.f32 %v1325_v22, 0.0  ;;  %v1463_v31 = vld [vmem:[%s3536_s5 + $0x130] sm:$0xff] }
 0x263   : > { %v1359_v48 = vpop.f32.mrf.mxu1  ;;  %v1409_v47 = vmax.f32 %v1315_v17, 0.0  ;;  %v1479_v22 = vld [vmem:[%s3536_s5 + $0x1b0] sm:$0xff]  ;;  %v1485_v17 = vld [vmem:[%s3536_s5 + $0x1e0] sm:$0xff] }
 0x264   : > { %v1360_v8 = vadd.f32 %v1359_v48, %v1136_v9  ;;  %v1410_v48 = vmax.f32 %v1320_v25, 0.0  ;;  %v1450_v9 = vld [vmem:[%s3536_s5 + $0xc8] sm:$0xff]  ;;  %v1484_v25 = vld [vmem:[%s3536_s5 + $0x1d8] sm:$0xff] }
 0x265   : > { %v1361_v49 = vpop.f32.mrf.mxu1 }
 0x266   : > { %v1418_v10 = vmax.f32 %v1360_v8, 0.0  ;;  %v1427_v49 = vld [vmem:[%s3536_s5 + $0x10] sm:$0xff]  ;;  %v1461_v8 = vld [vmem:[%s3536_s5 + $0x120] sm:$0xff] }
 0x267   : > { %v1364_v50 = vpop.f32.mrf.mxu1 }
 0x268   : > { %v1365_v28 = vadd.f32 %v1364_v50, %v1141_v4  ;;  %v1430_v50 = vld [vmem:[%s3536_s5 + $0x28] sm:$0xff]  ;;  %v1443_v4 = vld [vmem:[%s3536_s5 + $0x90] sm:$0xff] }
 0x269   : > { %v1366_v52 = vpop.f32.mrf.mxu1 }
 0x26a   : > { %v1419_v24 = vmax.f32 %v1365_v28, 0.0  ;;  %v1432_v52 = vld [vmem:[%s3536_s5 + $0x38] sm:$0xff] }
 0x26b   : > { %v1369_v54 = vpop.f32.mrf.mxu1  ;;  %v1460_v28 = vld [vmem:[%s3536_s5 + $0x118] sm:$0xff] }
 0x26c   : > { %v1370_v23 = vadd.f32 %v1369_v54, %v1146_v2  ;;  %v1434_v54 = vld [vmem:[%s3536_s5 + $0x48] sm:$0xff]  ;;  %v1441_v2 = vld [vmem:[%s3536_s5 + $0x80] sm:$0xff] }
 0x26d   : > { %v1371_v57 = vpop.f32.mrf.mxu1 }
 0x26e   : > { %v1420_v30 = vmax.f32 %v1370_v23, 0.0  ;;  %v1436_v57 = vld [vmem:[%s3536_s5 + $0x58] sm:$0xff]  ;;  %v1455_v23 = vld [vmem:[%s3536_s5 + $0xf0] sm:$0xff] }
 0x26f   : > { %v1374_v59 = vpop.f32.mrf.mxu1 }
 0x270   : > { %v1375_v19 = vadd.f32 %v1374_v59, %v1151_v62  ;;  %v1435_v59 = vld [vmem:[%s3536_s5 + $0x50] sm:$0xff]  ;;  %v1440_v62 = vld [vmem:[%s3536_s5 + $0x78] sm:$0xff] }
 0x271   : > { %v1376_v63 = vpop.f32.mrf.mxu1 }
 0x272   : > { %v1421_v13 = vmax.f32 %v1375_v19, 0.0  ;;  %v1437_v63 = vld [vmem:[%s3536_s5 + $0x60] sm:$0xff] }
 0x273   : > { %v1379_v0 = vpop.f32.mrf.mxu1  ;;  %v1453_v19 = vld [vmem:[%s3536_s5 + $0xe0] sm:$0xff] }
 0x274   : > { %v1380_v51 = vadd.f32 %v1379_v0, %v1156_v61  ;;  %v1438_v61 = vld [vmem:[%s3536_s5 + $0x68] sm:$0xff]  ;;  %v1439_v0 = vld [vmem:[%s3536_s5 + $0x70] sm:$0xff] }
 0x275   : > { %v1381_v1 = vpop.f32.mrf.mxu1 }
 0x276   : > { %v1422_v12 = vmax.f32 %v1380_v51, 0.0  ;;  %v1442_v1 = vld [vmem:[%s3536_s5 + $0x88] sm:$0xff]  ;;  %v1452_v51 = vld [vmem:[%s3536_s5 + $0xd8] sm:$0xff] }
 0x277   : > { %v1384_v55 = vpop.f32.mrf.mxu1 }
 0x278   : > { %v1385_v6 = vadd.f32 %v1384_v55, %v1161_v56  ;;  %v1433_v56 = vld [vmem:[%s3536_s5 + $0x40] sm:$0xff]  ;;  %v1444_v55 = vld [vmem:[%s3536_s5 + $0x98] sm:$0xff] }
 0x279   : > { %v1386_v5 = vpop.f32.mrf.mxu1 }
 0x27a   : > { %v1423_v20 = vmax.f32 %v1385_v6, 0.0  ;;  %v1446_v5 = vld [vmem:[%s3536_s5 + $0xa8] sm:$0xff]  ;;  %v1448_v6 = vld [vmem:[%s3536_s5 + $0xb8] sm:$0xff] }
 0x27b   : > { %v1389_v58 = vpop.f32.mrf.mxu1 }
 0x27c   : > { %v1390_v7 = vadd.f32 %v1389_v58, %v1166_v53  ;;  %v1431_v53 = vld [vmem:[%s3536_s5 + $0x30] sm:$0xff]  ;;  %v1445_v58 = vld [vmem:[%s3536_s5 + $0xa0] sm:$0xff] }
 0x27d   : > { %v1391_v11 = vpop.f32.mrf.mxu1 }
 0x27e   : > { %v1424_v44 = vmax.f32 %v1390_v7, 0.0  ;;  %v1447_v7 = vld [vmem:[%s3536_s5 + $0xb0] sm:$0xff]  ;;  %v1449_v11 = vld [vmem:[%s3536_s5 + $0xc0] sm:$0xff] }
 0x280   : > { %1714 = vmatpush2.msra.mxu0 %v1424_v44  ;;  %v1451_v44 = vld [vmem:[%s3536_s5 + $0xd0] sm:$0xff] }
 0x281   : > { %1715 = vmatprep.subr.mxu0 %v2364_v27 }
 0x282   : > { %1716 = vmatpush2.msra.mxu0 %v1423_v20  ;;  %v1456_v20 = vld [vmem:[%s3536_s5 + $0xf8] sm:$0xff] }
 0x283   : > { %1717 = vmatprep.subr.mxu0 %v2364_v27 }
 0x284   : > { %1718 = vmatpush2.msra.mxu0 %v1422_v12  ;;  %v1458_v12 = vld [vmem:[%s3536_s5 + $0x108] sm:$0xff] }
 0x285   : > { %1719 = vmatprep.subr.mxu0 %v2364_v27 }
 0x286   : > { %1720 = vmatpush2.msra.mxu0 %v1421_v13  ;;  %v1459_v13 = vld [vmem:[%s3536_s5 + $0x110] sm:$0xff] }
 0x287   : > { %1721 = vmatprep.subr.mxu0 %v2364_v27 }
 0x288   : > { %1722 = vmatpush2.msra.mxu0 %v1420_v30  ;;  %v1464_v30 = vld [vmem:[%s3536_s5 + $0x138] sm:$0xff] }
 0x289   : > { %1723 = vmatprep.subr.mxu0 %v2364_v27 }
 0x28a   : > { %1724 = vmatpush2.msra.mxu0 %v1419_v24  ;;  %v1466_v24 = vld [vmem:[%s3536_s5 + $0x148] sm:$0xff] }
 0x28b   : > { %1725 = vmatprep.subr.mxu0 %v2364_v27 }
 0x28c   : > { %1726 = vmatpush2.msra.mxu0 %v1418_v10  ;;  %v1467_v10 = vld [vmem:[%s3536_s5 + $0x150] sm:$0xff] }
 0x28d   : > { %1727 = vmatprep.subr.mxu0 %v2364_v27 }
 0x28e   : > { %1728 = vmatpush2.msra.mxu0 %v1417_v21  ;;  %v1472_v21 = vld [vmem:[%s3536_s5 + $0x178] sm:$0xff] }
 0x28f   : > { %1729 = vmatprep.subr.mxu0 %v2364_v27 }
 0x290   : > { %1730 = vmatpush2.msra.mxu0 %v1416_v37  ;;  %v1474_v37 = vld [vmem:[%s3536_s5 + $0x188] sm:$0xff] }
 0x291   : > { %1731 = vmatprep.subr.mxu0 %v2364_v27 }
 0x292   : > { %1732 = vmatpush2.msra.mxu0 %v1415_v41  ;;  %v1475_v41 = vld [vmem:[%s3536_s5 + $0x190] sm:$0xff] }
 0x293   : > { %1733 = vmatprep.subr.mxu0 %v2364_v27 }
 0x294   : > { %1734 = vmatpush2.msra.mxu0 %v1414_v42  ;;  %v1480_v42 = vld [vmem:[%s3536_s5 + $0x1b8] sm:$0xff] }
 0x295   : > { %1735 = vmatprep.subr.mxu0 %v2364_v27 }
 0x296   : > { %1736 = vmatpush2.msra.mxu0 %v1413_v43  ;;  %v1482_v43 = vld [vmem:[%s3536_s5 + $0x1c8] sm:$0xff] }
 0x297   : > { %1737 = vmatprep.subr.mxu0 %v2364_v27 }
 0x298   : > { %1738 = vmatpush2.msra.mxu0 %v1412_v45  ;;  %v1483_v45 = vld [vmem:[%s3536_s5 + $0x1d0] sm:$0xff] }
 0x299   : > { %1739 = vmatprep.subr.mxu0 %v2364_v27 }
 0x29a   : > { %1740 = vmatpush2.msra.mxu0 %v1411_v40  ;;  %v1488_v40 = vld [vmem:[%s3536_s5 + $0x1f8] sm:$0xff] }
 0x29b   : > { %1741 = vmatprep.subr.mxu0 %v2364_v27 }
 0x29c   : > { %1742 = vmatpush2.msra.mxu0 %v1410_v48  ;;  %v1487_v48 = vld [vmem:[%s3536_s5 + $0x1f0] sm:$0xff] }
 0x29d   : > { %1743 = vmatprep.subr.mxu0 %v2364_v27  ;;  %v1429_v27 = vld [vmem:[%s3536_s5 + $0x20] sm:$0xff] }
 0x29e   : > { %1744 = vmatpush2.msra.mxu0 %v1409_v47 }
 0x29f   : > { %1746 = vmatmul.mubr.f32.vlgmr.msra.gmra.mxu0 %v1425_v3 }
 0x2a0   : > { %1750 = vmatprep.mubr.f32.mxu0 %v1428_v60 }
 0x2a3   : > { %1751 = vmatmul.mubr.f32.gmra.mxu0 %v1427_v49 }
 0x2a4   : > { %1755 = vmatprep.mubr.f32.mxu0 %v1430_v50 }
 0x2a7   : > { %1756 = vmatmul.mubr.f32.gmra.mxu0 %v1429_v27 }
 0x2a8   : > { %1760 = vmatprep.mubr.f32.mxu0 %v1432_v52 }
 0x2ab   : > { %1761 = vmatmul.mubr.f32.gmra.mxu0 %v1431_v53 }
 0x2ac   : > { %1765 = vmatprep.mubr.f32.mxu0 %v1434_v54 }
 0x2af   : > { %1766 = vmatmul.mubr.f32.gmra.mxu0 %v1433_v56 }
 0x2b0   : > { %1770 = vmatprep.mubr.f32.mxu0 %v1436_v57 }
 0x2b3   : > { %1771 = vmatmul.mubr.f32.gmra.mxu0 %v1435_v59  ;;  %v1945_v59 = vlaneseq }
 0x2b4   : > { %1775 = vmatprep.mubr.f32.mxu0 %v1438_v61 }
 0x2b7   : > { %1776 = vmatmul.mubr.f32.gmra.mxu0 %v1437_v63 }
 0x2b8   : > { %1780 = vmatprep.mubr.f32.mxu0 %v1440_v62  ;;  %v3434_v62 = vshrl.u32 %v1945_v59, 7 }
 0x2ba   : > { %3548 = vst [vmem:[#allocation9_spill] sm:$0xff] %v3434_v62 }
 0x2bb   : > { %1781 = vmatmul.mubr.f32.gmra.mxu0 %v1439_v0 }
 0x2bc   : > { %1785 = vmatprep.mubr.f32.mxu0 %v1442_v1  ;;  %v3439_v1 = vld [vmem:[%s3538_s7] sm:$0x3] }
 0x2bd   : > { %3549 = vst [vmem:[#allocation10_spill] sm:$0xff] %v3439_v1 }
 0x2bf   : > { %1786 = vmatmul.mubr.f32.gmra.mxu0 %v1441_v2 }
 0x2c0   : > { %1790 = vmatprep.mubr.f32.mxu0 %v1444_v55  ;;  %v1956_v55 = vsub.s32 1, %v3434_v62 }
 0x2c3   : > { %1791 = vmatmul.mubr.f32.gmra.mxu0 %v1443_v4 }
 0x2c4   : > { %1795 = vmatprep.mubr.f32.mxu0 %v1446_v5  ;;  %v1957_v5 = vrot.slane %v3439_v1, %v1956_v55 }
 0x2c6   : > { %2024 = vmatprep.mubr.f32.mxu1 %v1957_v5 }
 0x2c7   : > { %1796 = vmatmul.mubr.f32.gmra.mxu0 %v1445_v58 }
 0x2c8   : > { %1800 = vmatprep.mubr.f32.mxu0 %v1448_v6 }
 0x2cb   : > { %1801 = vmatmul.mubr.f32.gmra.mxu0 %v1447_v7 }
 0x2cc   : > { %1805 = vmatprep.mubr.f32.mxu0 %v1450_v9 }
 0x2cf   : > { %1806 = vmatmul.mubr.f32.gmra.mxu0 %v1449_v11 }
 0x2d0   : > { %1810 = vmatprep.mubr.f32.mxu0 %v1452_v51 }
 0x2d3   : > { %1811 = vmatmul.mubr.f32.gmra.mxu0 %v1451_v44 }
 0x2d4   : > { %1815 = vmatprep.mubr.f32.mxu0 %v1454_v16 }
 0x2d7   : > { %1816 = vmatmul.mubr.f32.gmra.mxu0 %v1453_v19 }
 0x2d8   : > { %1820 = vmatprep.mubr.f32.mxu0 %v1456_v20 }
 0x2db   : > { %1821 = vmatmul.mubr.f32.gmra.mxu0 %v1455_v23 }
 0x2dc   : > { %1825 = vmatprep.mubr.f32.mxu0 %v1458_v12 }
 0x2df   : > { %1826 = vmatmul.mubr.f32.gmra.mxu0 %v1457_v26 }
 0x2e0   : > { %1830 = vmatprep.mubr.f32.mxu0 %v1460_v28 }
 0x2e3   : > { %1831 = vmatmul.mubr.f32.gmra.mxu0 %v1459_v13 }
 0x2e4   : > { %1835 = vmatprep.mubr.f32.mxu0 %v1462_v29  ;;  %v1679_v29 = vpop.permute.xlu0 %1678 }
 0x2e7   : > { %1836 = vmatmul.mubr.f32.gmra.mxu0 %v1461_v8 }
 0x2e8   : > { %1840 = vmatprep.mubr.f32.mxu0 %v1464_v30  ;;  %v1599_v30 = vpop.permute.xlu1 %1598 }
 0x2eb   : > { %1841 = vmatmul.mubr.f32.gmra.mxu0 %v1463_v31 }
 0x2ec   : > { %1845 = vmatprep.mubr.f32.mxu0 %v1466_v24 }
 0x2ef   : > { %1846 = vmatmul.mubr.f32.gmra.mxu0 %v1465_v32  ;;  %v1674_v32 = vpop.permute.xlu0 %1673 }
 0x2f0   : > { %1850 = vmatprep.mubr.f32.mxu0 %v1468_v33 }
 0x2f3   : > { %1851 = vmatmul.mubr.f32.gmra.mxu0 %v1467_v10  ;;  %v1594_v10 = vpop.permute.xlu1 %1593 }
 0x2f4   : > { %1855 = vmatprep.mubr.f32.mxu0 %v1470_v34 }
 0x2f7   : > { %1856 = vmatmul.mubr.f32.gmra.mxu0 %v1469_v35 }
 0x2f8   : > { %1860 = vmatprep.mubr.f32.mxu0 %v1472_v21  ;;  %v1669_v21 = vpop.permute.xlu0 %1668 }
 0x2fb   : > { %1861 = vmatmul.mubr.f32.gmra.mxu0 %v1471_v36 }
 0x2fc   : > { %1865 = vmatprep.mubr.f32.mxu0 %v1474_v37  ;;  %v1589_v37 = vpop.permute.xlu1 %1588 }
 0x2ff   : > { %1866 = vmatmul.mubr.f32.gmra.mxu0 %v1473_v38 }
 0x300   : > { %1870 = vmatprep.mubr.f32.mxu0 %v1476_v39 }
 0x303   : > { %1871 = vmatmul.mubr.f32.gmra.mxu0 %v1475_v41  ;;  %v1664_v41 = vpop.permute.xlu0 %1663 }
 0x304   : > { %1875 = vmatprep.mubr.f32.mxu0 %v1478_v18 }
 0x307   : > { %1876 = vmatmul.mubr.f32.gmra.mxu0 %v1477_v15  ;;  %v1584_v15 = vpop.permute.xlu1 %1583 }
 0x308   : > { %1880 = vmatprep.mubr.f32.mxu0 %v1480_v42 }
 0x30b   : > { %1881 = vmatmul.mubr.f32.gmra.mxu0 %v1479_v22 }
 0x30c   : > { %1885 = vmatprep.mubr.f32.mxu0 %v1482_v43  ;;  %v1659_v43 = vpop.permute.xlu0 %1658 }
 0x30f   : > { %1886 = vmatmul.mubr.f32.gmra.mxu0 %v1481_v14 }
 0x310   : > { %1890 = vmatprep.mubr.f32.mxu0 %v1484_v25  ;;  %v1579_v25 = vpop.permute.xlu1 %1578 }
 0x313   : > { %1891 = vmatmul.mubr.f32.gmra.mxu0 %v1483_v45 }
 0x314   : > { %1895 = vmatprep.mubr.f32.mxu0 %v1486_v46 }
 0x317   : > { %1896 = vmatmul.mubr.f32.gmra.mxu0 %v1485_v17  ;;  %v1654_v17 = vpop.permute.xlu0 %1653 }
 0x318   : > { %1900 = vmatprep.mubr.f32.mxu0 %v1488_v40 }
 0x31b   : > { %1901 = vmatmul.mubr.f32.gmra.mxu0 %v1487_v48  ;;  %v1574_v48 = vpop.permute.xlu1 %1573 }
 0x35f   : > { %v3420_v47 = vpop.f32.mrf.mxu0 }
 0x360   : > { %3545 = vst [vmem:[#allocation6_spill] sm:$0xff] %v3420_v47 }
 0x361   : > { %v1749_v3 = vpop.f32.mrf.mxu0 }
 0x363   : > { %v3422_v60 = vpop.f32.mrf.mxu0 }
 0x364   : > { %3546 = vst [vmem:[#allocation7_spill] sm:$0xff] %v3422_v60 }
 0x365   : > { %v1754_v49 = vpop.f32.mrf.mxu0 }
 0x367   : > { %v3424_v50 = vpop.f32.mrf.mxu0 }
 0x368   : > { %3547 = vst [vmem:[#allocation8_spill] sm:$0xff] %v3424_v50 }
 0x369   : > { %v1759_v27 = vpop.f32.mrf.mxu0 }
 0x36a   : > { %v1649_v27 = vpop.permute.xlu0 %1648 }
 0x36b   : > { %v3426_v52 = vpop.f32.mrf.mxu0 }
 0x36d   : > { %v1764_v53 = vpop.f32.mrf.mxu0 }
 0x36f   : > { %v3428_v54 = vpop.f32.mrf.mxu0 }
 0x371   : > { %v1769_v56 = vpop.f32.mrf.mxu0 }
 0x372   : > { %v1569_v56 = vpop.permute.xlu1 %1568 }
 0x373   : > { %v3430_v57 = vpop.f32.mrf.mxu0 }
 0x375   : > { %v1774_v61 = vpop.f32.mrf.mxu0 }
 0x377   : > { %v3432_v63 = vpop.f32.mrf.mxu0 }
 0x379   : > { %v1779_v0 = vpop.f32.mrf.mxu0 }
 0x37a   : > { %v1644_v0 = vpop.permute.xlu0 %1643 }
 0x37b   : > { %v3441_v2 = vpop.f32.mrf.mxu0 }
 0x37d   : > { %v1784_v4 = vpop.f32.mrf.mxu0 }
 0x37e   : > { %v1564_v4 = vpop.permute.xlu1 %1563 }
 0x37f   : > { %v3445_v58 = vpop.f32.mrf.mxu0 }
 0x381   : > { %v1789_v6 = vpop.f32.mrf.mxu0 }
 0x383   : > { %v3447_v7 = vpop.f32.mrf.mxu0 }
 0x385   : > { %v1794_v9 = vpop.f32.mrf.mxu0 }
 0x386   : > { %v1639_v9 = vpop.permute.xlu0 %1638 }
 0x387   : > { %v3449_v11 = vpop.f32.mrf.mxu0 }
 0x389   : > { %v1799_v51 = vpop.f32.mrf.mxu0 }
 0x38b   : > { %v3451_v44 = vpop.f32.mrf.mxu0 }
 0x38d   : > { %v1804_v16 = vpop.f32.mrf.mxu0 }
 0x38e   : > { %v1559_v16 = vpop.permute.xlu1 %1558 }
 0x38f   : > { %v3453_v19 = vpop.f32.mrf.mxu0 }
 0x391   : > { %v1809_v20 = vpop.f32.mrf.mxu0 }
 0x393   : > { %v3455_v23 = vpop.f32.mrf.mxu0 }
 0x395   : > { %v1814_v12 = vpop.f32.mrf.mxu0 }
 0x397   : > { %v1817_v26 = vpop.f32.mrf.mxu0 }
 0x398   : > { %v1818_v1 = vadd.f32 %v1817_v26, %v1594_v10  ;;  %v1803_v26 = vadd.f32 %v3451_v44, %v1579_v25  ;;  %v1783_v25 = vadd.f32 %v3441_v2, %v1559_v16 }
 0x399   : > { %v1819_v28 = vpop.f32.mrf.mxu0 }
 0x39a   : > { %v1634_v28 = vpop.permute.xlu0 %1633 }
 0x39b   : > { %v1822_v13 = vpop.f32.mrf.mxu0 }
 0x39d   : > { %v1824_v8 = vpop.f32.mrf.mxu0 }
 0x39f   : > { %v3457_v31 = vpop.f32.mrf.mxu0 }
 0x3a0   : > { %3550 = vst [vmem:[#allocation11_spill] sm:$0xff] %v3457_v31  ;;  %v1813_v31 = vadd.f32 %v3455_v23, %v1589_v37 }
 0x3a1   : > { %v1829_v24 = vpop.f32.mrf.mxu0 }
 0x3a2   : > { %v1554_v24 = vpop.permute.xlu1 %1553 }
 0x3a3   : > { %v3459_v33 = vpop.f32.mrf.mxu0 }
 0x3a4   : > { %3551 = vst [vmem:[#allocation12_spill] sm:$0xff] %v3459_v33 }
 0x3a5   : > { %v1834_v34 = vpop.f32.mrf.mxu0 }
 0x3a7   : > { %v3461_v35 = vpop.f32.mrf.mxu0 }
 0x3a9   : > { %v1839_v36 = vpop.f32.mrf.mxu0 }
 0x3ab   : > { %v3463_v38 = vpop.f32.mrf.mxu0 }
 0x3ad   : > { %v1844_v39 = vpop.f32.mrf.mxu0 }
 0x3ae   : > { %v1629_v39 = vpop.permute.xlu0 %1628 }
 0x3af   : > { %v3465_v18 = vpop.f32.mrf.mxu0 }
 0x3b1   : > { %v1849_v42 = vpop.f32.mrf.mxu0 }
 0x3b3   : > { %v3467_v22 = vpop.f32.mrf.mxu0 }
 0x3b5   : > { %v1854_v14 = vpop.f32.mrf.mxu0 }
 0x3b6   : > { %v1549_v14 = vpop.permute.xlu1 %1548 }
 0x3b7   : > { %v3469_v45 = vpop.f32.mrf.mxu0 }
 0x3b9   : > { %v1859_v46 = vpop.f32.mrf.mxu0 }
 0x3ba   : > { %v1823_v46 = vadd.f32 %v1822_v13, %v1599_v30  ;;  %v1544_v60 = vpop.permute.xlu1 %1543 }
 0x3bb   : > { %v3471_v40 = vpop.f32.mrf.mxu0 }
 0x3bd   : > { %v1864_v3 = vpop.f32.mrf.mxu0 }
 0x3bf   : > { %v1867_v49 = vpop.f32.mrf.mxu0 }
 0x3c1   : > { %v1869_v53 = vpop.f32.mrf.mxu0 }
 0x3c3   : > { %v1872_v59 = vpop.f32.mrf.mxu0 }
 0x3c5   : > { %v1874_v61 = vpop.f32.mrf.mxu0 }
 0x3c7   : > { %v1877_v55 = vpop.f32.mrf.mxu0 }
 0x3c9   : > { %v1879_v5 = vpop.f32.mrf.mxu0 }
 0x3cb   : > { %v1882_v6 = vpop.f32.mrf.mxu0 }
 0x3cc   : > { %v1883_v13 = vadd.f32 %v1882_v6, %v1659_v43 }
 0x3cd   : > { %v1884_v51 = vpop.f32.mrf.mxu0 }
 0x3ce   : > { %v1624_v51 = vpop.permute.xlu0 %1623 }
 0x3cf   : > { %v1887_v20 = vpop.f32.mrf.mxu0  ;;  %v1848_v2 = vadd.f32 %v3465_v18, %v1624_v51  ;;  %v3552_v18 = vld [vmem:[#allocation8_spill] sm:$0xff] }
 0x3d0   : > { %v1888_v33 = vadd.f32 %v1887_v20, %v1664_v41  ;;  %v1873_v41 = vadd.f32 %v1872_v59, %v1649_v27 }
 0x3d1   : > { %v1889_v12 = vpop.f32.mrf.mxu0 }
 0x3d2   : > { %v1921_v12 = vmax.f32 %v1823_v46, 0.0  ;;  %v1934_v10 = vmax.f32 %v1888_v33, 0.0  ;;  %v1619_v23 = vpop.permute.xlu0 %1618 }
 0x3d3   : > { %v1892_v8 = vpop.f32.mrf.mxu0 }
 0x3d4   : > { %v1893_v62 = vadd.f32 %v1892_v8, %v1669_v21  ;;  %v1798_v21 = vadd.f32 %v3449_v11, %v1574_v48  ;;  %v1931_v11 = vmax.f32 %v1873_v41, 0.0 }
 0x3d5   : > { %v1894_v34 = vpop.f32.mrf.mxu0 }
 0x3d6   : > { %v1808_v34 = vadd.f32 %v3453_v19, %v1584_v15  ;;  %v1935_v30 = vmax.f32 %v1893_v62, 0.0  ;;  %v1933_v19 = vmax.f32 %v1883_v13, 0.0  ;;  %v1917_v62 = vmax.f32 %v1803_v26, 0.0  ;;  %v1614_v43 = vpop.permute.xlu0 %1613 }
 0x3d7   : > { %v1897_v36 = vpop.f32.mrf.mxu0  ;;  %v1916_v33 = vmax.f32 %v1798_v21, 0.0  ;;  %v1863_v15 = vadd.f32 %v3471_v40, %v1639_v9  ;;  %v1773_v40 = vadd.f32 %v3430_v57, %v1549_v14  ;;  %v1843_v9 = vadd.f32 %v3463_v38, %v1619_v23  ;;  %v3554_v38 = vld [vmem:[#allocation7_spill] sm:$0xff] }
 0x3d8   : > { %v1898_v53 = vadd.f32 %v1897_v36, %v1674_v32  ;;  %v1878_v32 = vadd.f32 %v1877_v55, %v1654_v17  ;;  %v1918_v37 = vmax.f32 %v1808_v34, 0.0  ;;  %v1838_v57 = vadd.f32 %v3461_v35, %v1614_v43  ;;  %v3556_v35 = vld [vmem:[#allocation6_spill] sm:$0xff] }
 0x3d9   : > { %v1899_v42 = vpop.f32.mrf.mxu0  ;;  %v1929_v59 = vmax.f32 %v1863_v15, 0.0  ;;  %v1911_v20 = vmax.f32 %v1773_v40, 0.0  ;;  %v1925_v36 = vmax.f32 %v1843_v9, 0.0 }
 0x3da   : > { %v1936_v50 = vmax.f32 %v1898_v53, 0.0  ;;  %v1920_v42 = vmax.f32 %v1818_v1, 0.0  ;;  %v1793_v1 = vadd.f32 %v3447_v7, %v1569_v56  ;;  %v1932_v44 = vmax.f32 %v1878_v32, 0.0 }
 0x3db   : > { %v1902_v3 = vpop.f32.mrf.mxu0  ;;  %v1858_v7 = vadd.f32 %v3469_v45, %v1634_v28  ;;  %v1768_v45 = vadd.f32 %v3428_v54, %v1544_v60  ;;  %v1926_v28 = vmax.f32 %v1848_v2, 0.0  ;;  %v3553_v60 = vld [vmem:[#allocation12_spill] sm:$0xff] }
 0x3dc   : > { %v1903_v61 = vadd.f32 %v1902_v3, %v1679_v29  ;;  %v1919_v29 = vmax.f32 %v1813_v31, 0.0  ;;  %v1788_v31 = vadd.f32 %v3445_v58, %v1564_v4  ;;  %v1915_v17 = vmax.f32 %v1793_v1, 0.0  ;;  %v1609_v4 = vpop.permute.xlu0 %1608  ;;  %v3555_v3 = vld [vmem:[#allocation11_spill] sm:$0xff] }
 0x3dd   : > { %v1904_v5 = vpop.f32.mrf.mxu0  ;;  %v1853_v58 = vadd.f32 %v3467_v22, %v1629_v39  ;;  %v1928_v55 = vmax.f32 %v1858_v7, 0.0  ;;  %v1833_v54 = vadd.f32 %v3553_v60, %v1609_v4 }
 0x3de   : > { %v1937_v47 = vmax.f32 %v1903_v61, 0.0  ;;  %v1914_v56 = vmax.f32 %v1788_v31, 0.0  ;;  %v1924_v61 = vmax.f32 %v1838_v57, 0.0 }
 0x3df   : > { %v1927_v16 = vmax.f32 %v1853_v58, 0.0 }
 0x3e0   : > { %2173 = vmatprep.subr.mxu1 %v1937_v47  ;;  %v1539_v47 = vpop.permute.xlu1 %1538  ;;  %v1604_v39 = vpop.permute.xlu0 %1603 }
 0x3e1   : > { %2174 = vmatpush3.msra.mxu1 %v1921_v12  ;;  %v1763_v22 = vadd.f32 %v3426_v52, %v1539_v47  ;;  %v1828_v53 = vadd.f32 %v3555_v3, %v1604_v39  ;;  %v3557_v12 = vld [vmem:[#allocation9_spill] sm:$0xff] }
 0x3e2   : > { %2175 = vmatprep.subr.mxu1 %v1936_v50  ;;  %v1868_v50 = vadd.f32 %v1867_v49, %v1644_v0  ;;  %v1778_v49 = vadd.f32 %v3432_v63, %v1554_v24  ;;  %v1913_v0 = vmax.f32 %v1783_v25, 0.0  ;;  %v1910_v24 = vmax.f32 %v1768_v45, 0.0 }
 0x3e3   : > { %2176 = vmatpush3.msra.mxu1 %v1920_v42  ;;  %v1909_v46 = vmax.f32 %v1763_v22, 0.0  ;;  %v1947_v34 = vsub.s32 0, %v3557_v12  ;;  %v1923_v42 = vmax.f32 %v1833_v54, 0.0 }
 0x3e4   : > { %2177 = vmatprep.subr.mxu1 %v1935_v30  ;;  %v1534_v48 = vpop.permute.xlu1 %1533  ;;  %v1930_v27 = vmax.f32 %v1868_v50, 0.0  ;;  %v1912_v6 = vmax.f32 %v1778_v49, 0.0  ;;  %v3558_v30 = vld [vmem:[#allocation10_spill] sm:$0xff] }
 0x3e5   : > { %2178 = vmatpush3.msra.mxu1 %v1919_v29  ;;  %v1758_v8 = vadd.f32 %v3552_v18, %v1534_v48  ;;  %v1953_v26 = vrot.slane %v3558_v30, %v1947_v34  ;;  %v1922_v29 = vmax.f32 %v1828_v53, 0.0 }
 0x3e6   : > { %2179 = vmatprep.subr.mxu1 %v1934_v10  ;;  %v1943_v10 = vpop.permute.xlu0 %1942 }
 0x3e7   : > { %2180 = vmatpush3.msra.mxu1 %v1918_v37  ;;  %v1908_v51 = vmax.f32 %v1758_v8, 0.0  ;;  %v1948_v37 = vrot.slane %v1943_v10, %v1947_v34 }
 0x3e8   : > { %2181 = vmatprep.subr.mxu1 %v1933_v19  ;;  %v1529_v63 = vpop.permute.xlu1 %1528 }
 0x3e9   : > { %2182 = vmatpush3.msra.mxu1 %v1917_v62  ;;  %v1753_v14 = vadd.f32 %v3554_v38, %v1529_v63 }
 0x3ea   : > { %2183 = vmatprep.subr.mxu1 %v1932_v44 }
 0x3eb   : > { %2184 = vmatpush3.msra.mxu1 %v1916_v33  ;;  %v1907_v13 = vmax.f32 %v1753_v14, 0.0 }
 0x3ec   : > { %2185 = vmatprep.subr.mxu1 %v1931_v11  ;;  %v1524_v52 = vpop.permute.xlu1 %1523 }
 0x3ed   : > { %2186 = vmatpush3.msra.mxu1 %v1915_v17  ;;  %v1748_v5 = vadd.f32 %v3556_v35, %v1524_v52 }
 0x3ee   : > { %2187 = vmatprep.subr.mxu1 %v1930_v27 }
 0x3ef   : > { %2188 = vmatpush3.msra.mxu1 %v1914_v56  ;;  %v1906_v32 = vmax.f32 %v1748_v5, 0.0 }
 0x3f0   : > { %2189 = vmatprep.subr.mxu1 %v1929_v59 }
 0x3f1   : > { %2190 = vmatpush3.msra.mxu1 %v1913_v0 }
 0x3f2   : > { %2191 = vmatprep.subr.mxu1 %v1928_v55 }
 0x3f3   : > { %2192 = vmatpush3.msra.mxu1 %v1912_v6 }
 0x3f4   : > { %2193 = vmatprep.subr.mxu1 %v1927_v16 }
 0x3f5   : > { %2194 = vmatpush3.msra.mxu1 %v1911_v20 }
 0x3f6   : > { %2195 = vmatprep.subr.mxu1 %v1926_v28 }
 0x3f7   : > { %2196 = vmatpush3.msra.mxu1 %v1910_v24 }
 0x3f8   : > { %2197 = vmatprep.subr.mxu1 %v1925_v36 }
 0x3f9   : > { %2198 = vmatpush3.msra.mxu1 %v1909_v46 }
 0x3fa   : > { %2199 = vmatprep.subr.mxu1 %v1924_v61 }
 0x3fb   : > { %2200 = vmatpush3.msra.mxu1 %v1908_v51 }
 0x3fc   : > { %2201 = vmatprep.subr.mxu1 %v1923_v42 }
 0x3fd   : > { %2202 = vmatpush3.msra.mxu1 %v1907_v13 }
 0x3fe   : > { %2203 = vmatprep.subr.mxu1 %v1922_v29 }
 0x3ff   : > { %2204 = vmatpush3.msra.mxu1 %v1906_v32 }
 0x400   : > { %2025 = vmatmul.mubr.f32.vlgmr.msra.gmra.mxu1 %v1953_v26 }
 0x4c0   : > { %v2205_v23 = vpop.f32.mrf.mxu1 }
 0x4c2   : > { %v2206_v21 = vpop.f32.mrf.mxu1 }
 0x4c3   : > { %v2207_v47 = vadd.f32 %v2206_v21, %v2205_v23 }
 0x4c5   : > { %v2027_v41 = vadd.f32 %v2207_v47, %v1948_v37 }
 0x4c7   : > { %2030 = vst [vmem:[%s324_s23] sm:$0x1] %v2027_v41 }
 0x4c8   : > { %2314 = shalt.err (!%p2311_p3)
}
 0x4c9   : > { %s2315_s15 = scalar_lea.hbm %s2042_s27, 16  ;;  %s2319_s22 = scalar_lea.hbm %s3540_s9, 32 }
 0x4ca   : > { %p2316_p4 = scmp.ne.s32.totalorder %s2042_s27, %s2315_s15  ;;  %p2320_p9 = scmp.lt.s32.totalorder %s2042_s27, %s3540_s9 }
 0x4cb   : > { %p2321_p10 = scmp.lt.s32.totalorder %s2319_s22, %s2315_s15 }
 0x4cc   : > { %p2317_p7 = pnand %p2316_p4, %p2457_p5 }
 0x4cd   : > { %p2322_p11 = por %p2321_p10, %p2320_p9 }
 0x4ce   : > { %p2318_p8 = pneg %p2317_p7 }
 0x4d0   : > { %p2323_p12 = pnand %p2322_p11, %p2318_p8 }
 0x4d2   : > { %2326 = shalt.err (!%p2323_p12)
}
 0x4d3   : > { %2258 = dma.vmem_to_hbm [thread:$0]  (%p2457_p5), %s2045_s24, 16, %s2042_s27, %s2032_s29  }
 0x4d4 PF: > { %p2264_p13 = scmp.ge.s32.totalorder %s2361_s14, 2  ;;  %s2056_s26 = sand.u32 1, %s2349_s11  }
 0x4d5   : > { %s2057_s30 = scalar_lea.sflag [#allocation4], %s2056_s26 }
 0x4d6   : > { %p2261_p0 = pnand %p2264_p13, %p2461_p6 }
 0x4d8   : > { %p2262_p1 = pneg %p2261_p0 }
 0x4da   : > { %2344 = dma.done.wait (%p2262_p1), %s2057_s30, 16  }
 0x4db   : > { %2346 = vsyncadd (%p2262_p1), %s2057_s30, 4294967280  ;;  %p21_p2 = scmp.ge.s32.totalorder %s2444_s16, 4   ;;  %s3559_s11 = smov %s2353_s12 }
 0x4dc   : > { %s3560_s12 = smov %s2357_s13  ;;  %s3561_s13 = smov %s2455_s19 }
 0x4dd   : > { %s3562_s14 = smov %s2444_s16  ;;  %23 = sbr.rel (!%p21_p2) target bundleno = 6 (0x6), region = 91 }
 0x4e2   :  { %2061 = vsyncpa [#allocation4], 1 }
 0x4e3   :  { %2063 = vsyncpa [#allocation4 + $0x1], 1 }

</bundles_post_ra>
